<compile_context>
chip_gen: v7x
topology: tpu7x:2x2x1
jax: 0.10.0
libtpu: 0.0.40
codegen_flags: <defaults>
</compile_context>

<pallas_src>
import math
import jax
import jax.numpy as jnp
from jax.experimental import pallas as pl
from jax.experimental.pallas import tpu as pltpu

_LANE_MIN = 128
_SUBLANE = 8


def _round_up(n, m):
    return ((n + m - 1) // m) * m


def _lane_multiple():
    """256-lane feature padding on v6e/v7x (256x256 MXU), 128 on v5e and older."""
    try:
        kind = jax.devices()[0].device_kind.lower()
    except Exception:
        return _LANE_MIN
    for tag in ("v2", "v3", "v4", "v5"):
        if tag in kind:
            return _LANE_MIN
    return 256


def prepare_params(params, lane=None, matmul_dtype=jnp.bfloat16):
    """Pad (and bf16-cast) all parameters ONCE; reuse across forward calls.

    params: list of (w, b) with w of shape (in_features, out_features).
    Returns (flat_params, meta) consumed by fully_connected_nn_forward.
    """
    if lane is None:
        lane = _lane_multiple()
    in_features = params[0][0].shape[0]
    out_features = params[-1][0].shape[1]

    flat, dims = [], []
    prev = in_features  # first-layer K stays unpadded: it must match x's unpadded lane dim
    for w, b in params:
        fi, fo = w.shape
        fop = _round_up(fo, lane)
        fip = prev
        wp = jnp.zeros((fip, fop), matmul_dtype).at[:fi, :fo].set(w.astype(matmul_dtype))
        bp = jnp.zeros((1, fop), jnp.float32).at[:, :fo].set(
            jnp.asarray(b, jnp.float32).reshape(1, -1))
        flat += [wp, bp]
        dims.append((fip, fop))
        prev = fop

    meta = dict(num_layers=len(params), in_features=in_features,
                out_features=out_features, dims=dims, out_pad=prev)
    return flat, meta


def _make_fused_mlp_kernel(num_layers, valid_out):
    """Kernel refs: (x_ref, w0_ref, b0_ref, ..., w{L-1}_ref, b{L-1}_ref, o_ref)."""

    def kernel(*refs):
        x_ref = refs[0]
        o_ref = refs[-1]
        wb = refs[1:-1]

        h = x_ref[...].astype(jnp.float32)

        # All layers chained entirely in VMEM/vregs; bf16 into the MXU, f32 accumulation,
        # bias-add / ReLU kept in f32 (v5e VPU has no bf16).
        for i in range(num_layers):
            w = wb[2 * i][...]                     # bf16 weight tile (VMEM-resident)
            b = wb[2 * i + 1][...]                 # f32 bias
            h = jnp.dot(h.astype(w.dtype), w, preferred_element_type=jnp.float32) + b
            if i < num_layers - 1:
                h = jnp.maximum(h, 0.0)

        # Numerically-stable softmax over the feature axis; padded lanes masked out.
        col = jax.lax.broadcasted_iota(jnp.int32, h.shape, dimension=1)
        logits = jnp.where(col < valid_out, h, jnp.float32(-1e30))
        m = jnp.max(logits, axis=1, keepdims=True)
        e = jnp.exp(logits - m)
        denom = jnp.sum(e, axis=1, keepdims=True)
        o_ref[...] = (e * pl.reciprocal(denom, approx=True)).astype(o_ref.dtype)

    return kernel


def fully_connected_nn_forward(x, flat_params, meta):
    """Forward pass matching FullyConnectedNN.forward: ReLU after every layer except the last,
    then Softmax(dim=1). Single fused Pallas kernel over batch tiles."""
    B = x.shape[0]
    in_features = meta["in_features"]
    out_features = meta["out_features"]
    out_pad = meta["out_pad"]
    num_layers = meta["num_layers"]
    assert x.shape[1] == in_features

    # Resident parameter footprint (weights bf16 + biases f32, single-buffered).
    resident_bytes = sum(int(a.size) * a.dtype.itemsize for a in flat_params)

    # Batch tile: multiple of 8 sublanes, up to 512 rows to fill the MXU M dim and amortize
    # the ~0.35us/step overhead, bounded by VMEM remaining after the resident weights.
    widths = [in_features] + [fop for (_, fop) in meta["dims"]]
    per_row_bytes = 4 * sum(widths) * 2 + 64          # rough live-activation estimate per row
    vmem_budget = 48 << 20                             # conservative (v7x has only 64 MiB)
    tb_vmem = max(_SUBLANE, (vmem_budget - resident_bytes) // max(per_row_bytes, 1))
    tb_vmem = max(_SUBLANE, (tb_vmem // _SUBLANE) * _SUBLANE)
    TB = min(_round_up(B, _SUBLANE), 512, tb_vmem)
    # Prefer >=2 grid steps when the batch allows, so both v7x TensorCores get work.
    if B >= 2 * _SUBLANE:
        TB = min(TB, _round_up(pl.cdiv(B, 2), _SUBLANE))
    Bp = _round_up(B, TB)

    # Only the batch dim is padded; the feature dim stays at in_features (full-array block).
    xp = x if Bp == B else jnp.zeros((Bp, in_features), x.dtype).at[:B].set(x)

    io_tile_bytes = 2 * TB * (in_features + out_pad) * 4 * 2   # double-buffered I/O tiles
    vmem_limit = int(min(max(resident_bytes + io_tile_bytes + TB * per_row_bytes + (8 << 20),
                             32 << 20), 112 << 20))

    kernel = _make_fused_mlp_kernel(num_layers, out_features)
    out_shape = jax.ShapeDtypeStruct((Bp, out_pad), x.dtype)
    x_spec = pl.BlockSpec((TB, in_features), lambda i: (i, 0))
    out_spec = pl.BlockSpec((TB, out_pad), lambda i: (i, 0))
    cparams = pltpu.CompilerParams(dimension_semantics=("parallel",),
                                   vmem_limit_bytes=vmem_limit)

    def _run(single_buffer_weights):
        in_specs = [x_spec]
        for a in flat_params:
            # Constant index_map -> weights/biases stay VMEM-resident across batch tiles.
            if single_buffer_weights:
                spec = pl.BlockSpec(a.shape, lambda i: (0, 0), pipeline_mode=pl.Buffered(1))
            else:
                spec = pl.BlockSpec(a.shape, lambda i: (0, 0))
            in_specs.append(spec)
        return pl.pallas_call(
            kernel,
            out_shape=out_shape,
            grid=(Bp // TB,),
            in_specs=in_specs,
            out_specs=out_spec,
            compiler_params=cparams,
        )(xp, *flat_params)

    # TODO(synk): add an N-tiled fallback (extra grid axis over the widest layer's output features)
    # when resident weights exceed ~70% of v7x VMEM, instead of whole-network residency.
    try:
        out_padded = _run(single_buffer_weights=True)
    except Exception:
        # Fallback if this jax build rejects pipeline_mode=pl.Buffered(1).
        out_padded = _run(single_buffer_weights=False)

    return out_padded[:B, :out_features]


def init_params(key, input_size, output_size, hidden_layer_width, depth, dtype=jnp.float32):
    """Deterministic PyTorch-style init: U(-1/sqrt(fan_in), 1/sqrt(fan_in)) for W and b."""
    dims = [input_size] + [hidden_layer_width] * depth + [output_size]
    params = []
    for fan_in, fan_out in zip(dims[:-1], dims[1:]):
        key, kw, kb = jax.random.split(key, 3)
        bound = 1.0 / math.sqrt(fan_in)
        w = jax.random.uniform(kw, (fan_in, fan_out), dtype=dtype, minval=-bound, maxval=bound)
        b = jax.random.uniform(kb, (1, fan_out), dtype=dtype, minval=-bound, maxval=bound)
        params.append((w, b))
    return params


def _reference_forward(x, params):
    h = x
    for w, b in params[:-1]:
        h = jnp.maximum(h @ w + b, 0.0)
    w, b = params[-1]
    return jax.nn.softmax(h @ w + b, axis=1)


if __name__ == "__main__":
    # Small shapes consistent with the config-driven MLP.
    batch = 8
    input_size = 32
    hidden_layer_width = 64
    depth = 3          # config['depth']: 'depth' hidden Linear layers before the output Linear
    output_size = 16

    key = jax.random.PRNGKey(0)
    key, kx = jax.random.split(key)
    x = jax.random.normal(kx, (batch, input_size), dtype=jnp.float32)

    params = init_params(key, input_size, output_size, hidden_layer_width, depth)
    flat_params, meta = prepare_params(params)        # pad + bf16-cast ONCE

    out = fully_connected_nn_forward(x, flat_params, meta)
    out = jax.block_until_ready(out)

    # Sanity: shape, softmax rows sum to ~1, matches the pure-JAX f32 reference
    # (tolerance covers bf16 matmuls + approximate reciprocal).
    assert out.shape == (batch, output_size)
    assert bool(jnp.all(jnp.abs(jnp.sum(out, axis=1) - 1.0) < 5e-3))
    ref = _reference_forward(x, params)
    assert bool(jnp.max(jnp.abs(out - ref)) < 2e-2)

    print("KERNEL_OK")
</pallas_src>

<mosaic_0001>
module attributes {stable_mosaic.version = 11 : i64} {
  func.func @kernel(%arg0: i32, %arg1: memref<8x32xf32, #tpu.memory_space<vmem>>, %arg2: memref<32x256xbf16, #tpu.memory_space<vmem>>, %arg3: memref<1x256xf32, #tpu.memory_space<vmem>>, %arg4: memref<256x256xbf16, #tpu.memory_space<vmem>>, %arg5: memref<1x256xf32, #tpu.memory_space<vmem>>, %arg6: memref<256x256xbf16, #tpu.memory_space<vmem>>, %arg7: memref<1x256xf32, #tpu.memory_space<vmem>>, %arg8: memref<256x256xbf16, #tpu.memory_space<vmem>>, %arg9: memref<1x256xf32, #tpu.memory_space<vmem>>, %arg10: memref<8x256xf32, #tpu.memory_space<vmem>>) attributes {dimension_semantics = [#tpu.dimension_semantics<parallel>], iteration_bounds = array<i64: 1>, scalar_prefetch = 0 : i64, scratch_operands = 0 : i64, tpu.core_type = #tpu.core_type<tc>, window_params = [{transform_indices = @transform_0, window_bounds = array<i64: 8, 32>}, {pipeline_mode = #tpu.pipeline_mode<synchronous>, transform_indices = @transform_1, window_bounds = array<i64: 32, 256>}, {pipeline_mode = #tpu.pipeline_mode<synchronous>, transform_indices = @transform_2, window_bounds = array<i64: 1, 256>}, {pipeline_mode = #tpu.pipeline_mode<synchronous>, transform_indices = @transform_3, window_bounds = array<i64: 256, 256>}, {pipeline_mode = #tpu.pipeline_mode<synchronous>, transform_indices = @transform_4, window_bounds = array<i64: 1, 256>}, {pipeline_mode = #tpu.pipeline_mode<synchronous>, transform_indices = @transform_5, window_bounds = array<i64: 256, 256>}, {pipeline_mode = #tpu.pipeline_mode<synchronous>, transform_indices = @transform_6, window_bounds = array<i64: 1, 256>}, {pipeline_mode = #tpu.pipeline_mode<synchronous>, transform_indices = @transform_7, window_bounds = array<i64: 256, 256>}, {pipeline_mode = #tpu.pipeline_mode<synchronous>, transform_indices = @transform_8, window_bounds = array<i64: 1, 256>}, {transform_indices = @transform_9, window_bounds = array<i64: 8, 256>}]} {
    %c0 = arith.constant 0 : index
    %c0_0 = arith.constant 0 : index
    %0 = vector.load %arg1[%c0, %c0_0] : memref<8x32xf32, #tpu.memory_space<vmem>>, vector<8x32xf32>
    %c0_1 = arith.constant 0 : index
    %c0_2 = arith.constant 0 : index
    %1 = vector.load %arg2[%c0_1, %c0_2] : memref<32x256xbf16, #tpu.memory_space<vmem>>, vector<32x256xbf16>
    %c0_3 = arith.constant 0 : index
    %c0_4 = arith.constant 0 : index
    %2 = vector.load %arg3[%c0_3, %c0_4] : memref<1x256xf32, #tpu.memory_space<vmem>>, vector<1x256xf32>
    %3 = arith.truncf %0 : vector<8x32xf32> to vector<8x32xbf16>
    %cst = arith.constant dense<0.000000e+00> : vector<8x256xf32>
    %4 = tpu.matmul %3, %1, %cst {dimension_numbers = #tpu.dot_dimension_numbers<[1], [0], [0], [1], [0, 0, 1, 1], [], []>} : vector<8x32xbf16>, vector<32x256xbf16>, vector<8x256xf32> -> vector<8x256xf32>
    %5 = vector.broadcast %2 : vector<1x256xf32> to vector<8x256xf32>
    %6 = arith.addf %4, %5 : vector<8x256xf32>
    %cst_5 = arith.constant 0.000000e+00 : f32
    %7 = vector.broadcast %cst_5 : f32 to vector<8x256xf32>
    %8 = arith.maximumf %6, %7 : vector<8x256xf32>
    %c0_6 = arith.constant 0 : index
    %c0_7 = arith.constant 0 : index
    %9 = vector.load %arg4[%c0_6, %c0_7] : memref<256x256xbf16, #tpu.memory_space<vmem>>, vector<256x256xbf16>
    %c0_8 = arith.constant 0 : index
    %c0_9 = arith.constant 0 : index
    %10 = vector.load %arg5[%c0_8, %c0_9] : memref<1x256xf32, #tpu.memory_space<vmem>>, vector<1x256xf32>
    %11 = arith.truncf %8 : vector<8x256xf32> to vector<8x256xbf16>
    %cst_10 = arith.constant dense<0.000000e+00> : vector<8x256xf32>
    %12 = tpu.matmul %11, %9, %cst_10 {dimension_numbers = #tpu.dot_dimension_numbers<[1], [0], [0], [1], [0, 0, 1, 1], [], []>} : vector<8x256xbf16>, vector<256x256xbf16>, vector<8x256xf32> -> vector<8x256xf32>
    %13 = vector.broadcast %10 : vector<1x256xf32> to vector<8x256xf32>
    %14 = arith.addf %12, %13 : vector<8x256xf32>
    %cst_11 = arith.constant 0.000000e+00 : f32
    %15 = vector.broadcast %cst_11 : f32 to vector<8x256xf32>
    %16 = arith.maximumf %14, %15 : vector<8x256xf32>
    %c0_12 = arith.constant 0 : index
    %c0_13 = arith.constant 0 : index
    %17 = vector.load %arg6[%c0_12, %c0_13] : memref<256x256xbf16, #tpu.memory_space<vmem>>, vector<256x256xbf16>
    %c0_14 = arith.constant 0 : index
    %c0_15 = arith.constant 0 : index
    %18 = vector.load %arg7[%c0_14, %c0_15] : memref<1x256xf32, #tpu.memory_space<vmem>>, vector<1x256xf32>
    %19 = arith.truncf %16 : vector<8x256xf32> to vector<8x256xbf16>
    %cst_16 = arith.constant dense<0.000000e+00> : vector<8x256xf32>
    %20 = tpu.matmul %19, %17, %cst_16 {dimension_numbers = #tpu.dot_dimension_numbers<[1], [0], [0], [1], [0, 0, 1, 1], [], []>} : vector<8x256xbf16>, vector<256x256xbf16>, vector<8x256xf32> -> vector<8x256xf32>
    %21 = vector.broadcast %18 : vector<1x256xf32> to vector<8x256xf32>
    %22 = arith.addf %20, %21 : vector<8x256xf32>
    %cst_17 = arith.constant 0.000000e+00 : f32
    %23 = vector.broadcast %cst_17 : f32 to vector<8x256xf32>
    %24 = arith.maximumf %22, %23 : vector<8x256xf32>
    %c0_18 = arith.constant 0 : index
    %c0_19 = arith.constant 0 : index
    %25 = vector.load %arg8[%c0_18, %c0_19] : memref<256x256xbf16, #tpu.memory_space<vmem>>, vector<256x256xbf16>
    %c0_20 = arith.constant 0 : index
    %c0_21 = arith.constant 0 : index
    %26 = vector.load %arg9[%c0_20, %c0_21] : memref<1x256xf32, #tpu.memory_space<vmem>>, vector<1x256xf32>
    %27 = arith.truncf %24 : vector<8x256xf32> to vector<8x256xbf16>
    %cst_22 = arith.constant dense<0.000000e+00> : vector<8x256xf32>
    %28 = tpu.matmul %27, %25, %cst_22 {dimension_numbers = #tpu.dot_dimension_numbers<[1], [0], [0], [1], [0, 0, 1, 1], [], []>} : vector<8x256xbf16>, vector<256x256xbf16>, vector<8x256xf32> -> vector<8x256xf32>
    %29 = vector.broadcast %26 : vector<1x256xf32> to vector<8x256xf32>
    %30 = arith.addf %28, %29 : vector<8x256xf32>
    %31 = tpu.iota {dimensions = array<i32: 1>} : vector<8x256xi32>
    %c16_i32 = arith.constant 16 : i32
    %32 = vector.broadcast %c16_i32 : i32 to vector<8x256xi32>
    %33 = arith.cmpi slt, %31, %32 : vector<8x256xi32>
    %cst_23 = arith.constant -1.000000e+30 : f32
    %34 = vector.broadcast %cst_23 : f32 to vector<8x256xf32>
    %35 = arith.select %33, %30, %34 : vector<8x256xi1>, vector<8x256xf32>
    %cst_24 = arith.constant dense<0xFF800000> : vector<8xf32>
    %36 = vector.multi_reduction <maximumf>, %35, %cst_24 [1] : vector<8x256xf32> to vector<8xf32>
    %37 = vector.shape_cast %36 : vector<8xf32> to vector<8x1xf32>
    %38 = vector.broadcast %37 : vector<8x1xf32> to vector<8x256xf32>
    %39 = arith.subf %35, %38 : vector<8x256xf32>
    %40 = math.exp %39 : vector<8x256xf32>
    %cst_25 = arith.constant dense<0.000000e+00> : vector<8xf32>
    %41 = vector.multi_reduction <add>, %40, %cst_25 [1] : vector<8x256xf32> to vector<8xf32>
    %42 = vector.shape_cast %41 : vector<8xf32> to vector<8x1xf32>
    %43 = tpu.reciprocal %42 {approx = true} : vector<8x1xf32> -> vector<8x1xf32>
    %44 = vector.broadcast %43 : vector<8x1xf32> to vector<8x256xf32>
    %45 = arith.mulf %40, %44 : vector<8x256xf32>
    %c0_26 = arith.constant 0 : index
    %c0_27 = arith.constant 0 : index
    %46 = vector.load %arg10[%c0_26, %c0_27] : memref<8x256xf32, #tpu.memory_space<vmem>>, vector<8x256xf32>
    tpu.vector_store %arg10[%c0_26, %c0_27], %45 {strides = array<i32>} : memref<8x256xf32, #tpu.memory_space<vmem>>, vector<8x256xf32>,
    return
  }
  func.func @transform_0(%arg0: i32) -> (i32, i32) {
    %c0_i32 = arith.constant 0 : i32
    %c0_i32_0 = arith.constant 0 : i32
    return %arg0, %c0_i32 : i32, i32
  }
  func.func @transform_1(%arg0: i32) -> (i32, i32) {
    %c0_i32 = arith.constant 0 : i32
    %c0_i32_0 = arith.constant 0 : i32
    %c0_i32_1 = arith.constant 0 : i32
    return %c0_i32, %c0_i32_0 : i32, i32
  }
  func.func @transform_2(%arg0: i32) -> (i32, i32) {
    %c0_i32 = arith.constant 0 : i32
    %c0_i32_0 = arith.constant 0 : i32
    %c0_i32_1 = arith.constant 0 : i32
    return %c0_i32, %c0_i32_0 : i32, i32
  }
  func.func @transform_3(%arg0: i32) -> (i32, i32) {
    %c0_i32 = arith.constant 0 : i32
    %c0_i32_0 = arith.constant 0 : i32
    %c0_i32_1 = arith.constant 0 : i32
    return %c0_i32, %c0_i32_0 : i32, i32
  }
  func.func @transform_4(%arg0: i32) -> (i32, i32) {
    %c0_i32 = arith.constant 0 : i32
    %c0_i32_0 = arith.constant 0 : i32
    %c0_i32_1 = arith.constant 0 : i32
    return %c0_i32, %c0_i32_0 : i32, i32
  }
  func.func @transform_5(%arg0: i32) -> (i32, i32) {
    %c0_i32 = arith.constant 0 : i32
    %c0_i32_0 = arith.constant 0 : i32
    %c0_i32_1 = arith.constant 0 : i32
    return %c0_i32, %c0_i32_0 : i32, i32
  }
  func.func @transform_6(%arg0: i32) -> (i32, i32) {
    %c0_i32 = arith.constant 0 : i32
    %c0_i32_0 = arith.constant 0 : i32
    %c0_i32_1 = arith.constant 0 : i32
    return %c0_i32, %c0_i32_0 : i32, i32
  }
  func.func @transform_7(%arg0: i32) -> (i32, i32) {
    %c0_i32 = arith.constant 0 : i32
    %c0_i32_0 = arith.constant 0 : i32
    %c0_i32_1 = arith.constant 0 : i32
    return %c0_i32, %c0_i32_0 : i32, i32
  }
  func.func @transform_8(%arg0: i32) -> (i32, i32) {
    %c0_i32 = arith.constant 0 : i32
    %c0_i32_0 = arith.constant 0 : i32
    %c0_i32_1 = arith.constant 0 : i32
    return %c0_i32, %c0_i32_0 : i32, i32
  }
  func.func @transform_9(%arg0: i32) -> (i32, i32) {
    %c0_i32 = arith.constant 0 : i32
    %c0_i32_0 = arith.constant 0 : i32
    return %arg0, %c0_i32 : i32, i32
  }
}

module attributes {stable_mosaic.version = 11 : i64} {
  func.func @kernel(%arg0: i32, %arg1: memref<8x32xf32, #tpu.memory_space<vmem>>, %arg2: memref<32x256xbf16, #tpu.memory_space<vmem>>, %arg3: memref<1x256xf32, #tpu.memory_space<vmem>>, %arg4: memref<256x256xbf16, #tpu.memory_space<vmem>>, %arg5: memref<1x256xf32, #tpu.memory_space<vmem>>, %arg6: memref<256x256xbf16, #tpu.memory_space<vmem>>, %arg7: memref<1x256xf32, #tpu.memory_space<vmem>>, %arg8: memref<256x256xbf16, #tpu.memory_space<vmem>>, %arg9: memref<1x256xf32, #tpu.memory_space<vmem>>, %arg10: memref<8x256xf32, #tpu.memory_space<vmem>>) attributes {dimension_semantics = [#tpu.dimension_semantics<parallel>], iteration_bounds = array<i64: 1>, scalar_prefetch = 0 : i64, scratch_operands = 0 : i64, tpu.core_type = #tpu.core_type<tc>, window_params = [{transform_indices = @transform_0, window_bounds = array<i64: 8, 32>}, {pipeline_mode = #tpu.pipeline_mode<synchronous>, transform_indices = @transform_1, window_bounds = array<i64: 32, 256>}, {pipeline_mode = #tpu.pipeline_mode<synchronous>, transform_indices = @transform_2, window_bounds = array<i64: 1, 256>}, {pipeline_mode = #tpu.pipeline_mode<synchronous>, transform_indices = @transform_3, window_bounds = array<i64: 256, 256>}, {pipeline_mode = #tpu.pipeline_mode<synchronous>, transform_indices = @transform_4, window_bounds = array<i64: 1, 256>}, {pipeline_mode = #tpu.pipeline_mode<synchronous>, transform_indices = @transform_5, window_bounds = array<i64: 256, 256>}, {pipeline_mode = #tpu.pipeline_mode<synchronous>, transform_indices = @transform_6, window_bounds = array<i64: 1, 256>}, {pipeline_mode = #tpu.pipeline_mode<synchronous>, transform_indices = @transform_7, window_bounds = array<i64: 256, 256>}, {pipeline_mode = #tpu.pipeline_mode<synchronous>, transform_indices = @transform_8, window_bounds = array<i64: 1, 256>}, {transform_indices = @transform_9, window_bounds = array<i64: 8, 256>}]} {
    %c0 = arith.constant 0 : index
    %c0_0 = arith.constant 0 : index
    %0 = vector.load %arg1[%c0, %c0_0] : memref<8x32xf32, #tpu.memory_space<vmem>>, vector<8x32xf32>
    %c0_1 = arith.constant 0 : index
    %c0_2 = arith.constant 0 : index
    %1 = vector.load %arg2[%c0_1, %c0_2] : memref<32x256xbf16, #tpu.memory_space<vmem>>, vector<32x256xbf16>
    %c0_3 = arith.constant 0 : index
    %c0_4 = arith.constant 0 : index
    %2 = vector.load %arg3[%c0_3, %c0_4] : memref<1x256xf32, #tpu.memory_space<vmem>>, vector<1x256xf32>
    %3 = arith.truncf %0 : vector<8x32xf32> to vector<8x32xbf16>
    %cst = arith.constant dense<0.000000e+00> : vector<8x256xf32>
    %4 = tpu.matmul %3, %1, %cst {dimension_numbers = #tpu.dot_dimension_numbers<[1], [0], [0], [1], [0, 0, 1, 1], [], []>} : vector<8x32xbf16>, vector<32x256xbf16>, vector<8x256xf32> -> vector<8x256xf32>
    %5 = vector.broadcast %2 : vector<1x256xf32> to vector<8x256xf32>
    %6 = arith.addf %4, %5 : vector<8x256xf32>
    %cst_5 = arith.constant 0.000000e+00 : f32
    %7 = vector.broadcast %cst_5 : f32 to vector<8x256xf32>
    %8 = arith.maximumf %6, %7 : vector<8x256xf32>
    %c0_6 = arith.constant 0 : index
    %c0_7 = arith.constant 0 : index
    %9 = vector.load %arg4[%c0_6, %c0_7] : memref<256x256xbf16, #tpu.memory_space<vmem>>, vector<256x256xbf16>
    %c0_8 = arith.constant 0 : index
    %c0_9 = arith.constant 0 : index
    %10 = vector.load %arg5[%c0_8, %c0_9] : memref<1x256xf32, #tpu.memory_space<vmem>>, vector<1x256xf32>
    %11 = arith.truncf %8 : vector<8x256xf32> to vector<8x256xbf16>
    %cst_10 = arith.constant dense<0.000000e+00> : vector<8x256xf32>
    %12 = tpu.matmul %11, %9, %cst_10 {dimension_numbers = #tpu.dot_dimension_numbers<[1], [0], [0], [1], [0, 0, 1, 1], [], []>} : vector<8x256xbf16>, vector<256x256xbf16>, vector<8x256xf32> -> vector<8x256xf32>
    %13 = vector.broadcast %10 : vector<1x256xf32> to vector<8x256xf32>
    %14 = arith.addf %12, %13 : vector<8x256xf32>
    %cst_11 = arith.constant 0.000000e+00 : f32
    %15 = vector.broadcast %cst_11 : f32 to vector<8x256xf32>
    %16 = arith.maximumf %14, %15 : vector<8x256xf32>
    %c0_12 = arith.constant 0 : index
    %c0_13 = arith.constant 0 : index
    %17 = vector.load %arg6[%c0_12, %c0_13] : memref<256x256xbf16, #tpu.memory_space<vmem>>, vector<256x256xbf16>
    %c0_14 = arith.constant 0 : index
    %c0_15 = arith.constant 0 : index
    %18 = vector.load %arg7[%c0_14, %c0_15] : memref<1x256xf32, #tpu.memory_space<vmem>>, vector<1x256xf32>
    %19 = arith.truncf %16 : vector<8x256xf32> to vector<8x256xbf16>
    %cst_16 = arith.constant dense<0.000000e+00> : vector<8x256xf32>
    %20 = tpu.matmul %19, %17, %cst_16 {dimension_numbers = #tpu.dot_dimension_numbers<[1], [0], [0], [1], [0, 0, 1, 1], [], []>} : vector<8x256xbf16>, vector<256x256xbf16>, vector<8x256xf32> -> vector<8x256xf32>
    %21 = vector.broadcast %18 : vector<1x256xf32> to vector<8x256xf32>
    %22 = arith.addf %20, %21 : vector<8x256xf32>
    %cst_17 = arith.constant 0.000000e+00 : f32
    %23 = vector.broadcast %cst_17 : f32 to vector<8x256xf32>
    %24 = arith.maximumf %22, %23 : vector<8x256xf32>
    %c0_18 = arith.constant 0 : index
    %c0_19 = arith.constant 0 : index
    %25 = vector.load %arg8[%c0_18, %c0_19] : memref<256x256xbf16, #tpu.memory_space<vmem>>, vector<256x256xbf16>
    %c0_20 = arith.constant 0 : index
    %c0_21 = arith.constant 0 : index
    %26 = vector.load %arg9[%c0_20, %c0_21] : memref<1x256xf32, #tpu.memory_space<vmem>>, vector<1x256xf32>
    %27 = arith.truncf %24 : vector<8x256xf32> to vector<8x256xbf16>
    %cst_22 = arith.constant dense<0.000000e+00> : vector<8x256xf32>
    %28 = tpu.matmul %27, %25, %cst_22 {dimension_numbers = #tpu.dot_dimension_numbers<[1], [0], [0], [1], [0, 0, 1, 1], [], []>} : vector<8x256xbf16>, vector<256x256xbf16>, vector<8x256xf32> -> vector<8x256xf32>
    %29 = vector.broadcast %26 : vector<1x256xf32> to vector<8x256xf32>
    %30 = arith.addf %28, %29 : vector<8x256xf32>
    %31 = tpu.iota {dimensions = array<i32: 1>} : vector<8x256xi32>
    %c16_i32 = arith.constant 16 : i32
    %32 = vector.broadcast %c16_i32 : i32 to vector<8x256xi32>
    %33 = arith.cmpi slt, %31, %32 : vector<8x256xi32>
    %cst_23 = arith.constant -1.000000e+30 : f32
    %34 = vector.broadcast %cst_23 : f32 to vector<8x256xf32>
    %35 = arith.select %33, %30, %34 : vector<8x256xi1>, vector<8x256xf32>
    %cst_24 = arith.constant dense<0xFF800000> : vector<8xf32>
    %36 = vector.multi_reduction <maximumf>, %35, %cst_24 [1] : vector<8x256xf32> to vector<8xf32>
    %37 = vector.shape_cast %36 : vector<8xf32> to vector<8x1xf32>
    %38 = vector.broadcast %37 : vector<8x1xf32> to vector<8x256xf32>
    %39 = arith.subf %35, %38 : vector<8x256xf32>
    %40 = math.exp %39 : vector<8x256xf32>
    %cst_25 = arith.constant dense<0.000000e+00> : vector<8xf32>
    %41 = vector.multi_reduction <add>, %40, %cst_25 [1] : vector<8x256xf32> to vector<8xf32>
    %42 = vector.shape_cast %41 : vector<8xf32> to vector<8x1xf32>
    %43 = tpu.reciprocal %42 {approx = true} : vector<8x1xf32> -> vector<8x1xf32>
    %44 = vector.broadcast %43 : vector<8x1xf32> to vector<8x256xf32>
    %45 = arith.mulf %40, %44 : vector<8x256xf32>
    %c0_26 = arith.constant 0 : index
    %c0_27 = arith.constant 0 : index
    %46 = vector.load %arg10[%c0_26, %c0_27] : memref<8x256xf32, #tpu.memory_space<vmem>>, vector<8x256xf32>
    tpu.vector_store %arg10[%c0_26, %c0_27], %45 {strides = array<i32>} : memref<8x256xf32, #tpu.memory_space<vmem>>, vector<8x256xf32>,
    return
  }
  func.func @transform_0(%arg0: i32) -> (i32, i32) {
    %c0_i32 = arith.constant 0 : i32
    %c0_i32_0 = arith.constant 0 : i32
    return %arg0, %c0_i32 : i32, i32
  }
  func.func @transform_1(%arg0: i32) -> (i32, i32) {
    %c0_i32 = arith.constant 0 : i32
    %c0_i32_0 = arith.constant 0 : i32
    %c0_i32_1 = arith.constant 0 : i32
    return %c0_i32, %c0_i32_0 : i32, i32
  }
  func.func @transform_2(%arg0: i32) -> (i32, i32) {
    %c0_i32 = arith.constant 0 : i32
    %c0_i32_0 = arith.constant 0 : i32
    %c0_i32_1 = arith.constant 0 : i32
    return %c0_i32, %c0_i32_0 : i32, i32
  }
  func.func @transform_3(%arg0: i32) -> (i32, i32) {
    %c0_i32 = arith.constant 0 : i32
    %c0_i32_0 = arith.constant 0 : i32
    %c0_i32_1 = arith.constant 0 : i32
    return %c0_i32, %c0_i32_0 : i32, i32
  }
  func.func @transform_4(%arg0: i32) -> (i32, i32) {
    %c0_i32 = arith.constant 0 : i32
    %c0_i32_0 = arith.constant 0 : i32
    %c0_i32_1 = arith.constant 0 : i32
    return %c0_i32, %c0_i32_0 : i32, i32
  }
  func.func @transform_5(%arg0: i32) -> (i32, i32) {
    %c0_i32 = arith.constant 0 : i32
    %c0_i32_0 = arith.constant 0 : i32
    %c0_i32_1 = arith.constant 0 : i32
    return %c0_i32, %c0_i32_0 : i32, i32
  }
  func.func @transform_6(%arg0: i32) -> (i32, i32) {
    %c0_i32 = arith.constant 0 : i32
    %c0_i32_0 = arith.constant 0 : i32
    %c0_i32_1 = arith.constant 0 : i32
    return %c0_i32, %c0_i32_0 : i32, i32
  }
  func.func @transform_7(%arg0: i32) -> (i32, i32) {
    %c0_i32 = arith.constant 0 : i32
    %c0_i32_0 = arith.constant 0 : i32
    %c0_i32_1 = arith.constant 0 : i32
    return %c0_i32, %c0_i32_0 : i32, i32
  }
  func.func @transform_8(%arg0: i32) -> (i32, i32) {
    %c0_i32 = arith.constant 0 : i32
    %c0_i32_0 = arith.constant 0 : i32
    %c0_i32_1 = arith.constant 0 : i32
    return %c0_i32, %c0_i32_0 : i32, i32
  }
  func.func @transform_9(%arg0: i32) -> (i32, i32) {
    %c0_i32 = arith.constant 0 : i32
    %c0_i32_0 = arith.constant 0 : i32
    return %arg0, %c0_i32 : i32, i32
  }
}

</mosaic_0001>

<bundles_post_ra>
// kernel: tpu_custom_call.1
= control target key start
LH: loop header
LB: loop body
LE: loop exit
PB: predicated region body
PF: predicated region fallthrough
CT: control target
= control target key end

     0   :  { %14 = vsyncpa [#allocation3], 0  ;;  %s1545_s0 = inlined_call_operand.hbm [shape: f32[8,32], index: 0, kind: input, shape index: {}]   ;;  %s1546_s1 = inlined_call_operand.hbm [shape: bf16[32,256], index: 1, kind: input, shape index: {}]   ;;  %s1547_s2 = inlined_call_operand.vmem [shape: f32[1,256], index: 2, kind: input, shape index: {}]   ;;  %s1548_s3 = inlined_call_operand.hbm [shape: bf16[256,256], index: 3, kind: input, shape index: {}]   ;;  %s1549_s4 = inlined_call_operand.vmem [shape: f32[1,256], index: 4, kind: input, shape index: {}]   ;;  %s1550_s5 = inlined_call_operand.hbm [shape: bf16[256,256], index: 5, kind: input, shape index: {}]   ;;  %s1551_s6 = inlined_call_operand.vmem [shape: f32[1,256], index: 6, kind: input, shape index: {}]   ;;  %s1552_s7 = inlined_call_operand.hbm [shape: bf16[256,256], index: 7, kind: input, shape index: {}]   ;;  %s1553_s8 = inlined_call_operand.vmem [shape: f32[1,256], index: 8, kind: input, shape index: {}]   ;;  %s1554_s9 = inlined_call_operand.hbm [shape: f32[8,256], index: 9, kind: output, shape index: {}]  }
   0x1   :  { %15 = vsyncpa [#allocation6], 0 }
   0x2   :  { %16 = vsyncpa [#allocation9], 0 }
   0x3   :  { %17 = vsyncpa [#allocation4], 0  ;;  %s1377_s30 = smov [#allocation5]   ;;  %s1237_s13 = scalar_lea.hbm %s1546_s1, 512 }
   0x4   :  { %s33_s10 = sshll.u32 %s1377_s30, 4  ;;  %p1238_p0 = scmp.ne.s32.totalorder %s1546_s1, %s1237_s13  ;;  %s34_s10 = int_to_ptr.vmem [resolvable:$true] %s33_s10 }
   0x5   :  { %p1241_p1 = scmp.lt.u32.totalorder %s1237_s13, %s1546_s1 }
   0x7   :  { %p1243_p2 = pnand %p1241_p1, %p1238_p0 }
   0x9   :  { %1246 = shalt.err (!%p1243_p2)
}
   0xa   :  { %s1247_s18 = scalar_lea.vmem %s34_s10, 512  ;;  %p1252_p4 = scmp.lt.s32.totalorder %s34_s10, %s34_s10 }
   0xb   :  { %p1248_p3 = scmp.ne.s32.totalorder %s34_s10, %s1247_s18  ;;  %p1253_p5 = scmp.lt.s32.totalorder %s1247_s18, %s1247_s18 }
   0xd   :  { %p1254_p6 = por %p1253_p5, %p1252_p4 }
   0xf   :  { %p1255_p7 = pnand %p1254_p6, %p1248_p3 }
  0x11   :  { %1258 = shalt.err (!%p1255_p7)
}
  0x12   :  { %s1378_s19 = smov 128   ;;  %s1379_s20 = smov 8  }
  0x13   :  { %39 = dma.hbm_to_vmem [thread:$0]  %s1546_s1, 512, %s34_s10, [#allocation6], %s1378_s19, %s1378_s19, %s1379_s20  }
  0x14   :  { %s1380_s23 = smov [#allocation8]   ;;  %s1381_s25 = smov [#allocation2]  }
  0x15   :  { %s61_s24 = sshll.u32 %s1380_s23, 4  ;;  %s24_s26 = sshll.u32 %s1381_s25, 4  ;;  %s62_s24 = int_to_ptr.vmem [resolvable:$true] %s61_s24  ;;  %s25_s26 = int_to_ptr.vmem [resolvable:$true] %s24_s26 }
  0x16   :  { %s1259_s29 = scalar_lea.hbm %s1550_s5, 4096 }
  0x17   :  { %p1260_p8 = scmp.ne.s32.totalorder %s1550_s5, %s1259_s29  ;;  %p1263_p9 = scmp.lt.u32.totalorder %s1259_s29, %s1550_s5 }
  0x19   :  { %p1265_p10 = pnand %p1263_p9, %p1260_p8 }
  0x1b   :  { %1268 = shalt.err (!%p1265_p10)
}
  0x1c   :  { %s1269_s1 = scalar_lea.vmem %s62_s24, 4096  ;;  %p1274_p12 = scmp.lt.s32.totalorder %s62_s24, %s62_s24 }
  0x1d   :  { %p1270_p11 = scmp.ne.s32.totalorder %s62_s24, %s1269_s1  ;;  %p1275_p13 = scmp.lt.s32.totalorder %s1269_s1, %s1269_s1 }
  0x1f   :  { %p1276_p0 = por %p1275_p13, %p1274_p12 }
  0x21   :  { %p1277_p1 = pnand %p1276_p0, %p1270_p11 }
  0x23   :  { %1280 = shalt.err (!%p1277_p1)
}
  0x24   :  { %67 = dma.hbm_to_vmem [thread:$0]  %s1550_s5, 4096, %s62_s24, [#allocation9], %s1378_s19, %s1378_s19, %s1379_s20  }
  0x25   :  { %s1281_s17 = scalar_lea.hbm %s1545_s0, 128 }
  0x26   :  { %p1282_p2 = scmp.ne.s32.totalorder %s1545_s0, %s1281_s17  ;;  %p1285_p3 = scmp.lt.u32.totalorder %s1281_s17, %s1545_s0 }
  0x28   :  { %p1287_p4 = pnand %p1285_p3, %p1282_p2 }
  0x2a   :  { %1290 = shalt.err (!%p1287_p4)
}
  0x2b   :  { %s1291_s25 = scalar_lea.vmem %s25_s26, 128  ;;  %p1296_p6 = scmp.lt.s32.totalorder %s25_s26, %s25_s26 }
  0x2c   :  { %p1292_p5 = scmp.ne.s32.totalorder %s25_s26, %s1291_s25  ;;  %p1297_p7 = scmp.lt.s32.totalorder %s1291_s25, %s1291_s25 }
  0x2e   :  { %p1298_p8 = por %p1297_p7, %p1296_p6 }
  0x30   :  { %p1299_p9 = pnand %p1298_p8, %p1292_p5 }
  0x32   :  { %1302 = shalt.err (!%p1299_p9)
}
  0x33   :  { %27 = dma.hbm_to_vmem [thread:$0]  %s1545_s0, 128, %s25_s26, [#allocation3]  }
  0x34   :  { %s1382_s27 = smov [#allocation7]   ;;  %s1383_s29 = smov [#allocation10]  }
  0x35   :  { %s47_s28 = sshll.u32 %s1382_s27, 4  ;;  %s75_s30 = sshll.u32 %s1383_s29, 4  ;;  %s48_s28 = int_to_ptr.vmem [resolvable:$true] %s47_s28  ;;  %s76_s30 = int_to_ptr.vmem [resolvable:$true] %s75_s30 }
  0x36   :  { %s1303_s13 = scalar_lea.hbm %s1548_s3, 4096 }
  0x37   :  { %p1304_p10 = scmp.ne.s32.totalorder %s1548_s3, %s1303_s13  ;;  %p1307_p11 = scmp.lt.u32.totalorder %s1303_s13, %s1548_s3 }
  0x39   :  { %p1309_p12 = pnand %p1307_p11, %p1304_p10 }
  0x3b   :  { %1312 = shalt.err (!%p1309_p12)
}
  0x3c   :  { %s1313_s0 = scalar_lea.vmem %s48_s28, 4096  ;;  %p1318_p0 = scmp.lt.s32.totalorder %s48_s28, %s48_s28 }
  0x3d   :  { %p1314_p13 = scmp.ne.s32.totalorder %s48_s28, %s1313_s0  ;;  %p1319_p1 = scmp.lt.s32.totalorder %s1313_s0, %s1313_s0 }
  0x3f   :  { %p1320_p2 = por %p1319_p1, %p1318_p0 }
  0x41   :  { %p1321_p3 = pnand %p1320_p2, %p1314_p13 }
  0x43   :  { %1324 = shalt.err (!%p1321_p3)
}
  0x44   :  { %53 = dma.hbm_to_vmem [thread:$0]  %s1548_s3, 4096, %s48_s28, [#allocation6], %s1378_s19, %s1378_s19, %s1379_s20  }
  0x45   :  { %s1325_s21 = scalar_lea.hbm %s1552_s7, 4096 }
  0x46   :  { %p1326_p4 = scmp.ne.s32.totalorder %s1552_s7, %s1325_s21  ;;  %p1329_p5 = scmp.lt.u32.totalorder %s1325_s21, %s1552_s7 }
  0x48   :  { %p1331_p6 = pnand %p1329_p5, %p1326_p4 }
  0x4a   :  { %1334 = shalt.err (!%p1331_p6)
}
  0x4b   :  { %s1335_s24 = scalar_lea.vmem %s76_s30, 4096  ;;  %p1340_p8 = scmp.lt.s32.totalorder %s76_s30, %s76_s30 }
  0x4c   :  { %p1336_p7 = scmp.ne.s32.totalorder %s76_s30, %s1335_s24  ;;  %p1341_p9 = scmp.lt.s32.totalorder %s1335_s24, %s1335_s24 }
  0x4e   :  { %p1342_p10 = por %p1341_p9, %p1340_p8 }
  0x50   :  { %p1343_p11 = pnand %p1342_p10, %p1336_p7 }
  0x52   :  { %1346 = shalt.err (!%p1343_p11)
}
  0x53   :  { %81 = dma.hbm_to_vmem [thread:$0]  %s1552_s7, 4096, %s76_s30, [#allocation9], %s1378_s19, %s1378_s19, %s1379_s20  }
  0x54   :  { %1369 = dma.done.wait [#allocation3], 128  }
  0x55   :  { %1370 = vsyncadd [#allocation3], 4294967168 }
  0x56   :  { %1371 = dma.done.wait [#allocation6], 4608  }
  0x57   :  { %1372 = vsyncadd [#allocation6], 4294962688 }
  0x58   :  { %1373 = dma.done.wait [#allocation9], 8192  }
  0x59   :  { %1374 = vsyncadd [#allocation9], 4294959104  ;;  %v1384_v0 = vmov 0   ;;  %v1081_v1 = vld [vmem:[#allocation5 + $0x4] ss:$8 sps:$4 sm:$0xff]   ;;  %v100_v5 = vld [vmem:[#allocation2] sm:$0xff] }
  0x5a   :  { %174 = vmatprep.mubr.bf16.mxu0 %v1384_v0  ;;  %v1083_v2 = vld [vmem:[#allocation5] ss:$8 sps:$4 sm:$0xff]   ;;  %142 = vmatprep.subr.bf16.mxu0 %v1081_v1  ;;  %v1084_v3 = vld [vmem:[#allocation5 + $0x14] ss:$8 sps:$4 sm:$0xff]   ;;  %v1086_v4 = vld [vmem:[#allocation5 + $0x10] ss:$8 sps:$4 sm:$0xff]   ;;  %v106_v9 = vpack.c.bf16 %v100_v5, %v100_v5 }
  0x5b   :  { %143 = vmatpush1.bf16.msra.mxu0 %v1083_v2  ;;  %v1087_v6 = vld [vmem:[#allocation7 + $0x4] ss:$8 sps:$4 sm:$0xff]   ;;  %v1089_v7 = vld [vmem:[#allocation7] ss:$8 sps:$4 sm:$0xff]   ;;  %v1090_v8 = vld [vmem:[#allocation7 + $0x14] ss:$8 sps:$4 sm:$0xff]  }
  0x5c   :  { %144 = vmatprep.subr.bf16.mxu0 %v1084_v3  ;;  %391 = vmatprep.subr.bf16.mxu1 %v1087_v6  ;;  %v1092_v10 = vld [vmem:[#allocation7 + $0x10] ss:$8 sps:$4 sm:$0xff]   ;;  %vm138_vm0 = vcmask 261120   ;;  %v1093_v11 = vld [vmem:[#allocation7 + $0x24] ss:$8 sps:$4 sm:$0xff]   ;;  %v108_v3 = vlaneseq }
  0x5d   :  { %392 = vmatpush1.bf16.msra.mxu1 %v1089_v7  ;;  %v1095_v12 = vld [vmem:[#allocation7 + $0x20] ss:$8 sps:$4 sm:$0xff]   ;;  %v1096_v13 = vld [vmem:[#allocation7 + $0x34] ss:$8 sps:$4 sm:$0xff]   ;;  %v1098_v14 = vld [vmem:[#allocation7 + $0x30] ss:$8 sps:$4 sm:$0xff]  }
  0x5e   :  { %393 = vmatprep.subr.bf16.mxu1 %v1090_v8  ;;  %v1099_v15 = vld [vmem:[#allocation7 + $0x44] ss:$8 sps:$4 sm:$0xff]   ;;  %v1101_v16 = vld [vmem:[#allocation7 + $0x40] ss:$8 sps:$4 sm:$0xff]   ;;  %v1102_v17 = vld [vmem:[#allocation7 + $0x54] ss:$8 sps:$4 sm:$0xff]  }
  0x5f   :  { %145 = vmatpush1.bf16.msra.mxu0 %v1086_v4  ;;  %v1104_v18 = vld [vmem:[#allocation7 + $0x50] ss:$8 sps:$4 sm:$0xff]   ;;  %v1105_v19 = vld [vmem:[#allocation7 + $0x64] ss:$8 sps:$4 sm:$0xff]   ;;  %v1107_v20 = vld [vmem:[#allocation7 + $0x60] ss:$8 sps:$4 sm:$0xff]  }
  0x60   :  { %v1108_v21 = vld [vmem:[#allocation7 + $0x74] ss:$8 sps:$4 sm:$0xff]   ;;  %v1110_v22 = vld [vmem:[#allocation7 + $0x70] ss:$8 sps:$4 sm:$0xff]   ;;  %v1111_v23 = vld [vmem:[#allocation7 + $0x84] ss:$8 sps:$4 sm:$0xff]  }
  0x61   :  { %394 = vmatpush1.bf16.msra.mxu1 %v1092_v10  ;;  %v1113_v24 = vld [vmem:[#allocation7 + $0x80] ss:$8 sps:$4 sm:$0xff]   ;;  %v1114_v25 = vld [vmem:[#allocation7 + $0x94] ss:$8 sps:$4 sm:$0xff]   ;;  %v1116_v26 = vld [vmem:[#allocation7 + $0x90] ss:$8 sps:$4 sm:$0xff]  }
  0x62   :  { %975 = vmatmul.mubr.msk.bf16.vlgmr.msra.gmra.mrb[0].mxu0 %vm138_vm0, %v106_v9  ;;  %395 = vmatprep.subr.bf16.mxu1 %v1093_v11  ;;  %v1117_v27 = vld [vmem:[#allocation7 + $0xa4] ss:$8 sps:$4 sm:$0xff]   ;;  %v1119_v28 = vld [vmem:[#allocation7 + $0xa0] ss:$8 sps:$4 sm:$0xff]   ;;  %v1120_v29 = vld [vmem:[#allocation7 + $0xb4] ss:$8 sps:$4 sm:$0xff]  }
  0x63   :  { %v1122_v30 = vld [vmem:[#allocation7 + $0xb0] ss:$8 sps:$4 sm:$0xff]   ;;  %v1123_v31 = vld [vmem:[#allocation7 + $0xc4] ss:$8 sps:$4 sm:$0xff]   ;;  %v1125_v32 = vld [vmem:[#allocation7 + $0xc0] ss:$8 sps:$4 sm:$0xff]  }
  0x64   :  { %v1126_v33 = vld [vmem:[#allocation7 + $0xd4] ss:$8 sps:$4 sm:$0xff]   ;;  %v1128_v34 = vld [vmem:[#allocation7 + $0xd0] ss:$8 sps:$4 sm:$0xff]   ;;  %v1129_v35 = vld [vmem:[#allocation7 + $0xe4] ss:$8 sps:$4 sm:$0xff]  }
  0x65   :  { %396 = vmatpush1.bf16.msra.mxu1 %v1095_v12  ;;  %v1131_v36 = vld [vmem:[#allocation7 + $0xe0] ss:$8 sps:$4 sm:$0xff]   ;;  %v1132_v37 = vld [vmem:[#allocation7 + $0xf4] ss:$8 sps:$4 sm:$0xff]   ;;  %v1134_v38 = vld [vmem:[#allocation7 + $0xf0] ss:$8 sps:$4 sm:$0xff]  }
  0x66   :  { %397 = vmatprep.subr.bf16.mxu1 %v1096_v13  ;;  %v1135_v39 = vld [vmem:[#allocation8] ss:$8 sps:$4 sm:$0xff]   ;;  %v1137_v40 = vld [vmem:[#allocation8 + $0x4] ss:$8 sps:$4 sm:$0xff]   ;;  %v1140_v41 = vld [vmem:[#allocation8 + $0x14] ss:$8 sps:$4 sm:$0xff]  }
  0x67   :  { %640 = vmatprep.subr.bf16.mxu0 %v1137_v40  ;;  %v1138_v42 = vld [vmem:[#allocation8 + $0x10] ss:$8 sps:$4 sm:$0xff]   ;;  %v1143_v43 = vld [vmem:[#allocation8 + $0x24] ss:$8 sps:$4 sm:$0xff]   ;;  %v1141_v44 = vld [vmem:[#allocation8 + $0x20] ss:$8 sps:$4 sm:$0xff]  }
  0x68   :  { %641 = vmatpush1.bf16.msra.mxu0 %v1135_v39  ;;  %v1146_v45 = vld [vmem:[#allocation8 + $0x34] ss:$8 sps:$4 sm:$0xff]   ;;  %v1144_v46 = vld [vmem:[#allocation8 + $0x30] ss:$8 sps:$4 sm:$0xff]   ;;  %v1149_v47 = vld [vmem:[#allocation8 + $0x44] ss:$8 sps:$4 sm:$0xff]  }
  0x69   :  { %398 = vmatpush1.bf16.msra.mxu1 %v1098_v14  ;;  %642 = vmatprep.subr.bf16.mxu0 %v1140_v41  ;;  %v1147_v48 = vld [vmem:[#allocation8 + $0x40] ss:$8 sps:$4 sm:$0xff]   ;;  %v1152_v49 = vld [vmem:[#allocation8 + $0x54] ss:$8 sps:$4 sm:$0xff]   ;;  %v1150_v50 = vld [vmem:[#allocation8 + $0x50] ss:$8 sps:$4 sm:$0xff]  }
  0x6a   :  { %399 = vmatprep.subr.bf16.mxu1 %v1099_v15  ;;  %v1155_v51 = vld [vmem:[#allocation8 + $0x64] ss:$8 sps:$4 sm:$0xff]   ;;  %v1153_v52 = vld [vmem:[#allocation8 + $0x60] ss:$8 sps:$4 sm:$0xff]   ;;  %v1158_v53 = vld [vmem:[#allocation8 + $0x74] ss:$8 sps:$4 sm:$0xff]  }
  0x6b   :  { %v1156_v54 = vld [vmem:[#allocation8 + $0x70] ss:$8 sps:$4 sm:$0xff]   ;;  %v1161_v55 = vld [vmem:[#allocation8 + $0x84] ss:$8 sps:$4 sm:$0xff]   ;;  %v1159_v56 = vld [vmem:[#allocation8 + $0x80] ss:$8 sps:$4 sm:$0xff]  }
  0x6c   :  { %643 = vmatpush1.bf16.msra.mxu0 %v1138_v42  ;;  %v1164_v57 = vld [vmem:[#allocation8 + $0x94] ss:$8 sps:$4 sm:$0xff]   ;;  %v1162_v58 = vld [vmem:[#allocation8 + $0x90] ss:$8 sps:$4 sm:$0xff]   ;;  %v1167_v59 = vld [vmem:[#allocation8 + $0xa4] ss:$8 sps:$4 sm:$0xff]  }
  0x6d   :  { %400 = vmatpush1.bf16.msra.mxu1 %v1101_v16  ;;  %644 = vmatprep.subr.bf16.mxu0 %v1143_v43  ;;  %v1165_v60 = vld [vmem:[#allocation8 + $0xa0] ss:$8 sps:$4 sm:$0xff]   ;;  %v1170_v61 = vld [vmem:[#allocation8 + $0xb4] ss:$8 sps:$4 sm:$0xff]   ;;  %v1168_v62 = vld [vmem:[#allocation8 + $0xb0] ss:$8 sps:$4 sm:$0xff]  }
  0x6e   :  { %401 = vmatprep.subr.bf16.mxu1 %v1102_v17  ;;  %v1173_v63 = vld [vmem:[#allocation8 + $0xc4] ss:$8 sps:$4 sm:$0xff]   ;;  %v1171_v0 = vld [vmem:[#allocation8 + $0xc0] ss:$8 sps:$4 sm:$0xff]   ;;  %v1176_v1 = vld [vmem:[#allocation8 + $0xd4] ss:$8 sps:$4 sm:$0xff]  }
  0x6f   :  { %v1174_v2 = vld [vmem:[#allocation8 + $0xd0] ss:$8 sps:$4 sm:$0xff]   ;;  %v109_v4 = vshrl.u32 %v108_v3, 7  ;;  %v1209_v40 = vld [vmem:[#allocation10 + $0x84] ss:$8 sps:$4 sm:$0xff]  }
  0x70   :  { %645 = vmatpush1.bf16.msra.mxu0 %v1141_v44  ;;  %v105_v6 = vld [vmem:[%s1547_s2] sm:$0x3]  ;;  %v1207_v41 = vld [vmem:[#allocation10 + $0x80] ss:$8 sps:$4 sm:$0xff]   ;;  %v1212_v42 = vld [vmem:[#allocation10 + $0x94] ss:$8 sps:$4 sm:$0xff]  }
  0x71   :  { %402 = vmatpush1.bf16.msra.mxu1 %v1104_v18  ;;  %646 = vmatprep.subr.bf16.mxu0 %v1146_v45  ;;  %v1509_v5 = vsub.s32 0, %v109_v4  ;;  %v1514_v7 = vsub.s32 1, %v109_v4  ;;  %v1204_v39 = vld [vmem:[#allocation10 + $0x70] ss:$8 sps:$4 sm:$0xff]   ;;  %v1215_v44 = vld [vmem:[#allocation10 + $0xa4] ss:$8 sps:$4 sm:$0xff]  }
  0x72   :  { %403 = vmatprep.subr.bf16.mxu1 %v1105_v19  ;;  %v1210_v43 = vld [vmem:[#allocation10 + $0x90] ss:$8 sps:$4 sm:$0xff]   ;;  %v1213_v45 = vld [vmem:[#allocation10 + $0xa0] ss:$8 sps:$4 sm:$0xff]   ;;  %v1230_v4 = vld [vmem:[#allocation10 + $0xf4] ss:$8 sps:$4 sm:$0xff]  }
  0x73   :  { %v111_v8 = vrot.slane %v105_v6, %v1509_v5  ;;  %v115_v9 = vrot.slane %v105_v6, %v1514_v7  ;;  %v1228_v6 = vld [vmem:[#allocation10 + $0xf0] ss:$8 sps:$4 sm:$0xff]  }
  0x74   :  { %647 = vmatpush1.bf16.msra.mxu0 %v1144_v46  ;;  %v1218_v46 = vld [vmem:[#allocation10 + $0xb4] ss:$8 sps:$4 sm:$0xff]  }
  0x75   :  { %404 = vmatpush1.bf16.msra.mxu1 %v1107_v20  ;;  %648 = vmatprep.subr.bf16.mxu0 %v1149_v47  ;;  %v1179_v20 = vld [vmem:[#allocation8 + $0xe4] ss:$8 sps:$4 sm:$0xff]   ;;  %v1216_v47 = vld [vmem:[#allocation10 + $0xb0] ss:$8 sps:$4 sm:$0xff]  }
  0x76   :  { %405 = vmatprep.subr.bf16.mxu1 %v1108_v21  ;;  %v1177_v21 = vld [vmem:[#allocation8 + $0xe0] ss:$8 sps:$4 sm:$0xff]  }
  0x78   :  { %649 = vmatpush1.bf16.msra.mxu0 %v1147_v48  ;;  %v1221_v48 = vld [vmem:[#allocation10 + $0xc4] ss:$8 sps:$4 sm:$0xff]  }
  0x79   :  { %406 = vmatpush1.bf16.msra.mxu1 %v1110_v22  ;;  %650 = vmatprep.subr.bf16.mxu0 %v1152_v49  ;;  %v1182_v22 = vld [vmem:[#allocation8 + $0xf4] ss:$8 sps:$4 sm:$0xff]   ;;  %v1219_v49 = vld [vmem:[#allocation10 + $0xc0] ss:$8 sps:$4 sm:$0xff]  }
  0x7a   :  { %407 = vmatprep.subr.bf16.mxu1 %v1111_v23  ;;  %v1180_v23 = vld [vmem:[#allocation8 + $0xf0] ss:$8 sps:$4 sm:$0xff]  }
  0x7c   :  { %651 = vmatpush1.bf16.msra.mxu0 %v1150_v50  ;;  %v1224_v50 = vld [vmem:[#allocation10 + $0xd4] ss:$8 sps:$4 sm:$0xff]  }
  0x7d   :  { %408 = vmatpush1.bf16.msra.mxu1 %v1113_v24  ;;  %652 = vmatprep.subr.bf16.mxu0 %v1155_v51  ;;  %v1183_v24 = vld [vmem:[#allocation10] ss:$8 sps:$4 sm:$0xff]   ;;  %v1222_v51 = vld [vmem:[#allocation10 + $0xd0] ss:$8 sps:$4 sm:$0xff]  }
  0x7e   :  { %409 = vmatprep.subr.bf16.mxu1 %v1114_v25  ;;  %v1185_v25 = vld [vmem:[#allocation10 + $0x4] ss:$8 sps:$4 sm:$0xff]  }
  0x80   :  { %653 = vmatpush1.bf16.msra.mxu0 %v1153_v52  ;;  %v217_v52 = vld [vmem:[%s1549_s4] sm:$0x3] }
  0x81   :  { %410 = vmatpush1.bf16.msra.mxu1 %v1116_v26  ;;  %654 = vmatprep.subr.bf16.mxu0 %v1158_v53  ;;  %v1188_v26 = vld [vmem:[#allocation10 + $0x14] ss:$8 sps:$4 sm:$0xff]   ;;  %v224_v53 = vrot.slane %v217_v52, %v1509_v5 }
  0x82   :  { %411 = vmatprep.subr.bf16.mxu1 %v1117_v27  ;;  %v1186_v27 = vld [vmem:[#allocation10 + $0x10] ss:$8 sps:$4 sm:$0xff]  }
  0x84   :  { %655 = vmatpush1.bf16.msra.mxu0 %v1156_v54  ;;  %v228_v54 = vrot.slane %v217_v52, %v1514_v7 }
  0x85   :  { %412 = vmatpush1.bf16.msra.mxu1 %v1119_v28  ;;  %656 = vmatprep.subr.bf16.mxu0 %v1161_v55  ;;  %v1191_v28 = vld [vmem:[#allocation10 + $0x24] ss:$8 sps:$4 sm:$0xff]  }
  0x86   :  { %413 = vmatprep.subr.bf16.mxu1 %v1120_v29  ;;  %v1189_v29 = vld [vmem:[#allocation10 + $0x20] ss:$8 sps:$4 sm:$0xff]  }
  0x88   :  { %657 = vmatpush1.bf16.msra.mxu0 %v1159_v56 }
  0x89   :  { %414 = vmatpush1.bf16.msra.mxu1 %v1122_v30  ;;  %658 = vmatprep.subr.bf16.mxu0 %v1164_v57  ;;  %v1194_v30 = vld [vmem:[#allocation10 + $0x34] ss:$8 sps:$4 sm:$0xff]  }
  0x8a   :  { %415 = vmatprep.subr.bf16.mxu1 %v1123_v31  ;;  %v1192_v31 = vld [vmem:[#allocation10 + $0x30] ss:$8 sps:$4 sm:$0xff]  }
  0x8c   :  { %659 = vmatpush1.bf16.msra.mxu0 %v1162_v58 }
  0x8d   :  { %416 = vmatpush1.bf16.msra.mxu1 %v1125_v32  ;;  %660 = vmatprep.subr.bf16.mxu0 %v1167_v59  ;;  %v1197_v32 = vld [vmem:[#allocation10 + $0x44] ss:$8 sps:$4 sm:$0xff]  }
  0x8e   :  { %417 = vmatprep.subr.bf16.mxu1 %v1126_v33  ;;  %v1195_v33 = vld [vmem:[#allocation10 + $0x40] ss:$8 sps:$4 sm:$0xff]  }
  0x90   :  { %661 = vmatpush1.bf16.msra.mxu0 %v1165_v60 }
  0x91   :  { %418 = vmatpush1.bf16.msra.mxu1 %v1128_v34  ;;  %662 = vmatprep.subr.bf16.mxu0 %v1170_v61  ;;  %v1200_v34 = vld [vmem:[#allocation10 + $0x54] ss:$8 sps:$4 sm:$0xff]  }
  0x92   :  { %419 = vmatprep.subr.bf16.mxu1 %v1129_v35  ;;  %v1198_v35 = vld [vmem:[#allocation10 + $0x50] ss:$8 sps:$4 sm:$0xff]  }
  0x94   :  { %663 = vmatpush1.bf16.msra.mxu0 %v1168_v62 }
  0x95   :  { %420 = vmatpush1.bf16.msra.mxu1 %v1131_v36  ;;  %664 = vmatprep.subr.bf16.mxu0 %v1173_v63  ;;  %v1203_v36 = vld [vmem:[#allocation10 + $0x64] ss:$8 sps:$4 sm:$0xff]  }
  0x96   :  { %421 = vmatprep.subr.bf16.mxu1 %v1132_v37  ;;  %v1201_v37 = vld [vmem:[#allocation10 + $0x60] ss:$8 sps:$4 sm:$0xff]  }
  0x98   :  { %665 = vmatpush1.bf16.msra.mxu0 %v1171_v0 }
  0x99   :  { %422 = vmatpush1.bf16.msra.mxu1 %v1134_v38  ;;  %666 = vmatprep.subr.bf16.mxu0 %v1176_v1  ;;  %v1206_v38 = vld [vmem:[#allocation10 + $0x74] ss:$8 sps:$4 sm:$0xff]   ;;  %v1227_v1 = vld [vmem:[#allocation10 + $0xe4] ss:$8 sps:$4 sm:$0xff]  }
  0x9a   :  { %889 = vmatprep.subr.bf16.mxu1 %v1185_v25 }
  0x9c   :  { %667 = vmatpush1.bf16.msra.mxu0 %v1174_v2  ;;  %v1225_v2 = vld [vmem:[#allocation10 + $0xe0] ss:$8 sps:$4 sm:$0xff]  }
  0x9d   :  { %668 = vmatprep.subr.bf16.mxu0 %v1179_v20 }
  0xa0   :  { %669 = vmatpush1.bf16.msra.mxu0 %v1177_v21  ;;  %v715_v21 = vld [vmem:[%s1553_s8] sm:$0x3] }
  0xa1   :  { %670 = vmatprep.subr.bf16.mxu0 %v1182_v22  ;;  %v931_v22 = vand.u32 127, %v108_v3 }
  0xa3   :  { %vm933_vm1 = vcmp.lt.s32.totalorder %v931_v22, 16 }
  0xa4   :  { %671 = vmatpush1.bf16.msra.mxu0 %v1180_v23 }
 0x135   :  { %v176_v10 = vpop.f32.mrb[0].mxu0 }
 0x136   :  { %v177_v11 = vadd.f32 %v176_v10, %v111_v8  ;;  %v178_v12 = vpop.f32.mrb[1].mxu0  ;;  %v466_v8 = vld [vmem:[%s1551_s6] sm:$0x3]  ;;  %s1385_s6 = smov [#allocation11]  }
 0x137   :  { %v179_v13 = vadd.f32 %v178_v12, %v115_v9  ;;  %v180_v14 = vpop.f32.mrb[2].mxu0  ;;  %v473_v9 = vrot.slane %v466_v8, %v1509_v5  ;;  %v477_v10 = vrot.slane %v466_v8, %v1514_v7  ;;  %v722_v7 = vrot.slane %v715_v21, %v1509_v5  ;;  %s960_s8 = sshll.u32 %s1385_s6, 4  ;;  %s961_s8 = int_to_ptr.vmem [resolvable:$true] %s960_s8 }
 0x138   :  { %v183_v15 = vmax.f32 %v177_v11, 0.0  ;;  %v181_v16 = vpop.f32.mrb[3].mxu0  ;;  %s1347_s11 = scalar_lea.vmem %s961_s8, 256  ;;  %p1352_p13 = scmp.lt.s32.totalorder %s961_s8, %s961_s8 }
 0x139   :  { %v184_v17 = vmax.f32 %v179_v13, 0.0  ;;  %p1348_p12 = scmp.ne.s32.totalorder %s961_s8, %s1347_s11  ;;  %p1353_p0 = scmp.lt.s32.totalorder %s1347_s11, %s1347_s11 }
 0x13a   :  { %v218_v19 = vpack.c.bf16 %v183_v15, %v183_v15 }
 0x13b   :  { %v219_v18 = vpack.c.bf16 %v184_v17, %v184_v17  ;;  %p1354_p1 = por %p1353_p0, %p1352_p13 }
 0x13d   :  { %423 = vmatprep.mubr.bf16.mxu1 %v219_v18  ;;  %p1355_p2 = pnand %p1354_p1, %p1348_p12 }
 0x13e   :  { %424 = vmatmul.mubr.bf16.vlgmr.msra.gmra.mrb[0].mxu1 %v218_v19 }
 0x13f   :  { %890 = vmatpush1.bf16.msra.mxu1 %v1183_v24 }
 0x140   :  { %891 = vmatprep.subr.bf16.mxu1 %v1188_v26 }
 0x143   :  { %892 = vmatpush1.bf16.msra.mxu1 %v1186_v27 }
 0x144   :  { %893 = vmatprep.subr.bf16.mxu1 %v1191_v28 }
 0x147   :  { %894 = vmatpush1.bf16.msra.mxu1 %v1189_v29 }
 0x148   :  { %895 = vmatprep.subr.bf16.mxu1 %v1194_v30 }
 0x14b   :  { %896 = vmatpush1.bf16.msra.mxu1 %v1192_v31 }
 0x14c   :  { %897 = vmatprep.subr.bf16.mxu1 %v1197_v32 }
 0x14f   :  { %898 = vmatpush1.bf16.msra.mxu1 %v1195_v33 }
 0x150   :  { %899 = vmatprep.subr.bf16.mxu1 %v1200_v34 }
 0x153   :  { %900 = vmatpush1.bf16.msra.mxu1 %v1198_v35 }
 0x154   :  { %901 = vmatprep.subr.bf16.mxu1 %v1203_v36 }
 0x157   :  { %902 = vmatpush1.bf16.msra.mxu1 %v1201_v37 }
 0x158   :  { %903 = vmatprep.subr.bf16.mxu1 %v1206_v38 }
 0x15b   :  { %904 = vmatpush1.bf16.msra.mxu1 %v1204_v39 }
 0x15c   :  { %905 = vmatprep.subr.bf16.mxu1 %v1209_v40 }
 0x15f   :  { %906 = vmatpush1.bf16.msra.mxu1 %v1207_v41 }
 0x160   :  { %907 = vmatprep.subr.bf16.mxu1 %v1212_v42 }
 0x163   :  { %908 = vmatpush1.bf16.msra.mxu1 %v1210_v43 }
 0x164   :  { %909 = vmatprep.subr.bf16.mxu1 %v1215_v44 }
 0x167   :  { %910 = vmatpush1.bf16.msra.mxu1 %v1213_v45 }
 0x168   :  { %911 = vmatprep.subr.bf16.mxu1 %v1218_v46 }
 0x16b   :  { %912 = vmatpush1.bf16.msra.mxu1 %v1216_v47 }
 0x16c   :  { %913 = vmatprep.subr.bf16.mxu1 %v1221_v48 }
 0x16f   :  { %914 = vmatpush1.bf16.msra.mxu1 %v1219_v49 }
 0x170   :  { %915 = vmatprep.subr.bf16.mxu1 %v1224_v50 }
 0x173   :  { %916 = vmatpush1.bf16.msra.mxu1 %v1222_v51 }
 0x174   :  { %917 = vmatprep.subr.bf16.mxu1 %v1227_v1 }
 0x177   :  { %918 = vmatpush1.bf16.msra.mxu1 %v1225_v2 }
 0x178   :  { %919 = vmatprep.subr.bf16.mxu1 %v1230_v4 }
 0x17b   :  { %920 = vmatpush1.bf16.msra.mxu1 %v1228_v6 }
 0x211   :  { %v425_v55 = vpop.f32.mrb[0].mxu1 }
 0x212   :  { %v426_v56 = vadd.f32 %v425_v55, %v224_v53  ;;  %v427_v57 = vpop.f32.mrb[1].mxu1 }
 0x213   :  { %v428_v58 = vadd.f32 %v427_v57, %v228_v54  ;;  %v429_v59 = vpop.f32.mrb[2].mxu1 }
 0x214   :  { %v432_v60 = vmax.f32 %v426_v56, 0.0  ;;  %v430_v61 = vpop.f32.mrb[3].mxu1 }
 0x215   :  { %v433_v62 = vmax.f32 %v428_v58, 0.0 }
 0x216   :  { %v467_v0 = vpack.c.bf16 %v432_v60, %v432_v60 }
 0x217   :  { %v468_v63 = vpack.c.bf16 %v433_v62, %v433_v62 }
 0x219   :  { %672 = vmatprep.mubr.bf16.mxu0 %v468_v63 }
 0x21a   :  { %673 = vmatmul.mubr.bf16.vlgmr.msra.gmra.mrb[4].mxu0 %v467_v0 }
 0x2ed   :  { %v674_v11 = vpop.f32.mrb[4].mxu0 }
 0x2ee   :  { %v675_v12 = vadd.f32 %v674_v11, %v473_v9  ;;  %v676_v13 = vpop.f32.mrb[5].mxu0 }
 0x2ef   :  { %v677_v14 = vadd.f32 %v676_v13, %v477_v10  ;;  %v678_v15 = vpop.f32.mrb[6].mxu0 }
 0x2f0   :  { %v681_v16 = vmax.f32 %v675_v12, 0.0  ;;  %v679_v17 = vpop.f32.mrb[7].mxu0 }
 0x2f1   :  { %v682_v18 = vmax.f32 %v677_v14, 0.0 }
 0x2f2   :  { %v716_v20 = vpack.c.bf16 %v681_v16, %v681_v16 }
 0x2f3   :  { %v717_v19 = vpack.c.bf16 %v682_v18, %v682_v18 }
 0x2f5   :  { %921 = vmatprep.mubr.bf16.mxu1 %v717_v19 }
 0x2f6   :  { %922 = vmatmul.mubr.bf16.vlgmr.msra.gmra.mrb[4].mxu1 %v716_v20 }
 0x3c9   :  { %v923_v23 = vpop.f32.mrb[4].mxu1 }
 0x3ca   :  { %v924_v24 = vadd.f32 %v923_v23, %v722_v7  ;;  %v925_v25 = vpop.f32.mrb[5].mxu1 }
 0x3cb   :  { %v927_v26 = vpop.f32.mrb[6].mxu1 }
 0x3cc   :  { %v928_v27 = vpop.f32.mrb[7].mxu1  ;;  %v935_v28 = vsel %vm933_vm1, %v924_v24, -1e+30 }
 0x3cd   :  { %v937_v29 = vmax.f32 %v935_v28, -1e+30 }
 0x3cf   :  { %938 = vmax.xlane.f32.xlu0 %v937_v29 }
 0x45c   :  { %v939_v30 = vpop.xlane.xlu0 %938 }
 0x45d   :  { %v940_v31 = vsub.f32 %v935_v28, %v939_v30  ;;  %v941_v32 = vsub.f32 -1e+30, %v939_v30 }
 0x45f   :  { %v942_v33 = vmul.f32 1.442695, %v940_v31  ;;  %v944_v34 = vmul.f32 1.442695, %v941_v32 }
 0x461   :  { %1231 = vpow2.f32 %v942_v33 }
 0x462   :  { %1233 = vpow2.f32 %v944_v34 }
 0x46b   :  { %v1232_v35 = vpop.eup %1231 }
 0x46c   :  { %v1234_v3 = vpop.eup %1233 }
 0x46d   :  { %v946_v36 = vadd.f32 %v1234_v3, %v1232_v35 }
 0x46f   :  { %947 = vadd.xlane.f32.xlu0 %v946_v36 }
 0x4fc   :  { %v948_v5 = vpop.xlane.xlu0 %947 }
 0x4fd   :  { %1235 = vrcp.f32 %v948_v5 }
 0x507   :  { %v1236_v37 = vpop.eup %1235 }
 0x508   :  { %v950_v38 = vmul.f32 %v1236_v37, %v1232_v35  ;;  %v951_v39 = vmul.f32 %v1236_v37, %v1234_v3 }
 0x50a   :  { %952 = vst [vmem:[#allocation11] sm:$0xff] %v950_v38  ;;  %953 = vst [vmem:[#allocation11 + $0x8] sm:$0xff] %v951_v39 }
 0x50b   :  { %1358 = shalt.err (!%p1355_p2)
}
 0x50c   :  { %s1359_s1 = scalar_lea.hbm %s1554_s9, 256 }
 0x50d   :  { %p1360_p3 = scmp.ne.s32.totalorder %s1554_s9, %s1359_s1  ;;  %p1363_p4 = scmp.lt.u32.totalorder %s1359_s1, %s1554_s9 }
 0x50f   :  { %p1365_p5 = pnand %p1363_p4, %p1360_p3 }
 0x511   :  { %1368 = shalt.err (!%p1365_p5)
}
 0x512   :  { %963 = dma.vmem_to_hbm [thread:$0]  %s961_s8, 256, %s1554_s9, [#allocation4]  }
 0x513   :  { %1375 = dma.done.wait [#allocation4], 256  }
 0x514   :  { %1376 = vsyncadd [#allocation4], 4294967040 }
 0x515   :  { %967 = vsyncpa [#allocation3], 1 }
 0x516   :  { %968 = vsyncpa [#allocation6], 1 }
 0x517   :  { %969 = vsyncpa [#allocation9], 1 }
 0x518   :  { %970 = vsyncpa [#allocation4], 1 }

// kernel: tpu_custom_call.1
= control target key start
LH: loop header
LB: loop body
LE: loop exit
PB: predicated region body
PF: predicated region fallthrough
CT: control target
= control target key end

     0   :  { %14 = vsyncpa [#allocation3], 0  ;;  %s1545_s0 = inlined_call_operand.hbm [shape: f32[8,32], index: 0, kind: input, shape index: {}]   ;;  %s1546_s1 = inlined_call_operand.hbm [shape: bf16[32,256], index: 1, kind: input, shape index: {}]   ;;  %s1547_s2 = inlined_call_operand.vmem [shape: f32[1,256], index: 2, kind: input, shape index: {}]   ;;  %s1548_s3 = inlined_call_operand.hbm [shape: bf16[256,256], index: 3, kind: input, shape index: {}]   ;;  %s1549_s4 = inlined_call_operand.vmem [shape: f32[1,256], index: 4, kind: input, shape index: {}]   ;;  %s1550_s5 = inlined_call_operand.hbm [shape: bf16[256,256], index: 5, kind: input, shape index: {}]   ;;  %s1551_s6 = inlined_call_operand.vmem [shape: f32[1,256], index: 6, kind: input, shape index: {}]   ;;  %s1552_s7 = inlined_call_operand.hbm [shape: bf16[256,256], index: 7, kind: input, shape index: {}]   ;;  %s1553_s8 = inlined_call_operand.vmem [shape: f32[1,256], index: 8, kind: input, shape index: {}]   ;;  %s1554_s9 = inlined_call_operand.hbm [shape: f32[8,256], index: 9, kind: output, shape index: {}]  }
   0x1   :  { %15 = vsyncpa [#allocation6], 0 }
   0x2   :  { %16 = vsyncpa [#allocation9], 0 }
   0x3   :  { %17 = vsyncpa [#allocation4], 0  ;;  %s1377_s30 = smov [#allocation5]   ;;  %s1237_s13 = scalar_lea.hbm %s1546_s1, 512 }
   0x4   :  { %s33_s10 = sshll.u32 %s1377_s30, 4  ;;  %p1238_p0 = scmp.ne.s32.totalorder %s1546_s1, %s1237_s13  ;;  %s34_s10 = int_to_ptr.vmem [resolvable:$true] %s33_s10 }
   0x5   :  { %p1241_p1 = scmp.lt.u32.totalorder %s1237_s13, %s1546_s1 }
   0x7   :  { %p1243_p2 = pnand %p1241_p1, %p1238_p0 }
   0x9   :  { %1246 = shalt.err (!%p1243_p2)
}
   0xa   :  { %s1247_s18 = scalar_lea.vmem %s34_s10, 512  ;;  %p1252_p4 = scmp.lt.s32.totalorder %s34_s10, %s34_s10 }
   0xb   :  { %p1248_p3 = scmp.ne.s32.totalorder %s34_s10, %s1247_s18  ;;  %p1253_p5 = scmp.lt.s32.totalorder %s1247_s18, %s1247_s18 }
   0xd   :  { %p1254_p6 = por %p1253_p5, %p1252_p4 }
   0xf   :  { %p1255_p7 = pnand %p1254_p6, %p1248_p3 }
  0x11   :  { %1258 = shalt.err (!%p1255_p7)
}
  0x12   :  { %s1378_s19 = smov 128   ;;  %s1379_s20 = smov 8  }
  0x13   :  { %39 = dma.hbm_to_vmem [thread:$0]  %s1546_s1, 512, %s34_s10, [#allocation6], %s1378_s19, %s1378_s19, %s1379_s20  }
  0x14   :  { %s1380_s23 = smov [#allocation8]   ;;  %s1381_s25 = smov [#allocation2]  }
  0x15   :  { %s61_s24 = sshll.u32 %s1380_s23, 4  ;;  %s24_s26 = sshll.u32 %s1381_s25, 4  ;;  %s62_s24 = int_to_ptr.vmem [resolvable:$true] %s61_s24  ;;  %s25_s26 = int_to_ptr.vmem [resolvable:$true] %s24_s26 }
  0x16   :  { %s1259_s29 = scalar_lea.hbm %s1550_s5, 4096 }
  0x17   :  { %p1260_p8 = scmp.ne.s32.totalorder %s1550_s5, %s1259_s29  ;;  %p1263_p9 = scmp.lt.u32.totalorder %s1259_s29, %s1550_s5 }
  0x19   :  { %p1265_p10 = pnand %p1263_p9, %p1260_p8 }
  0x1b   :  { %1268 = shalt.err (!%p1265_p10)
}
  0x1c   :  { %s1269_s1 = scalar_lea.vmem %s62_s24, 4096  ;;  %p1274_p12 = scmp.lt.s32.totalorder %s62_s24, %s62_s24 }
  0x1d   :  { %p1270_p11 = scmp.ne.s32.totalorder %s62_s24, %s1269_s1  ;;  %p1275_p13 = scmp.lt.s32.totalorder %s1269_s1, %s1269_s1 }
  0x1f   :  { %p1276_p0 = por %p1275_p13, %p1274_p12 }
  0x21   :  { %p1277_p1 = pnand %p1276_p0, %p1270_p11 }
  0x23   :  { %1280 = shalt.err (!%p1277_p1)
}
  0x24   :  { %67 = dma.hbm_to_vmem [thread:$0]  %s1550_s5, 4096, %s62_s24, [#allocation9], %s1378_s19, %s1378_s19, %s1379_s20  }
  0x25   :  { %s1281_s17 = scalar_lea.hbm %s1545_s0, 128 }
  0x26   :  { %p1282_p2 = scmp.ne.s32.totalorder %s1545_s0, %s1281_s17  ;;  %p1285_p3 = scmp.lt.u32.totalorder %s1281_s17, %s1545_s0 }
  0x28   :  { %p1287_p4 = pnand %p1285_p3, %p1282_p2 }
  0x2a   :  { %1290 = shalt.err (!%p1287_p4)
}
  0x2b   :  { %s1291_s25 = scalar_lea.vmem %s25_s26, 128  ;;  %p1296_p6 = scmp.lt.s32.totalorder %s25_s26, %s25_s26 }
  0x2c   :  { %p1292_p5 = scmp.ne.s32.totalorder %s25_s26, %s1291_s25  ;;  %p1297_p7 = scmp.lt.s32.totalorder %s1291_s25, %s1291_s25 }
  0x2e   :  { %p1298_p8 = por %p1297_p7, %p1296_p6 }
  0x30   :  { %p1299_p9 = pnand %p1298_p8, %p1292_p5 }
  0x32   :  { %1302 = shalt.err (!%p1299_p9)
}
  0x33   :  { %27 = dma.hbm_to_vmem [thread:$0]  %s1545_s0, 128, %s25_s26, [#allocation3]  }
  0x34   :  { %s1382_s27 = smov [#allocation7]   ;;  %s1383_s29 = smov [#allocation10]  }
  0x35   :  { %s47_s28 = sshll.u32 %s1382_s27, 4  ;;  %s75_s30 = sshll.u32 %s1383_s29, 4  ;;  %s48_s28 = int_to_ptr.vmem [resolvable:$true] %s47_s28  ;;  %s76_s30 = int_to_ptr.vmem [resolvable:$true] %s75_s30 }
  0x36   :  { %s1303_s13 = scalar_lea.hbm %s1548_s3, 4096 }
  0x37   :  { %p1304_p10 = scmp.ne.s32.totalorder %s1548_s3, %s1303_s13  ;;  %p1307_p11 = scmp.lt.u32.totalorder %s1303_s13, %s1548_s3 }
  0x39   :  { %p1309_p12 = pnand %p1307_p11, %p1304_p10 }
  0x3b   :  { %1312 = shalt.err (!%p1309_p12)
}
  0x3c   :  { %s1313_s0 = scalar_lea.vmem %s48_s28, 4096  ;;  %p1318_p0 = scmp.lt.s32.totalorder %s48_s28, %s48_s28 }
  0x3d   :  { %p1314_p13 = scmp.ne.s32.totalorder %s48_s28, %s1313_s0  ;;  %p1319_p1 = scmp.lt.s32.totalorder %s1313_s0, %s1313_s0 }
  0x3f   :  { %p1320_p2 = por %p1319_p1, %p1318_p0 }
  0x41   :  { %p1321_p3 = pnand %p1320_p2, %p1314_p13 }
  0x43   :  { %1324 = shalt.err (!%p1321_p3)
}
  0x44   :  { %53 = dma.hbm_to_vmem [thread:$0]  %s1548_s3, 4096, %s48_s28, [#allocation6], %s1378_s19, %s1378_s19, %s1379_s20  }
  0x45   :  { %s1325_s21 = scalar_lea.hbm %s1552_s7, 4096 }
  0x46   :  { %p1326_p4 = scmp.ne.s32.totalorder %s1552_s7, %s1325_s21  ;;  %p1329_p5 = scmp.lt.u32.totalorder %s1325_s21, %s1552_s7 }
  0x48   :  { %p1331_p6 = pnand %p1329_p5, %p1326_p4 }
  0x4a   :  { %1334 = shalt.err (!%p1331_p6)
}
  0x4b   :  { %s1335_s24 = scalar_lea.vmem %s76_s30, 4096  ;;  %p1340_p8 = scmp.lt.s32.totalorder %s76_s30, %s76_s30 }
  0x4c   :  { %p1336_p7 = scmp.ne.s32.totalorder %s76_s30, %s1335_s24  ;;  %p1341_p9 = scmp.lt.s32.totalorder %s1335_s24, %s1335_s24 }
  0x4e   :  { %p1342_p10 = por %p1341_p9, %p1340_p8 }
  0x50   :  { %p1343_p11 = pnand %p1342_p10, %p1336_p7 }
  0x52   :  { %1346 = shalt.err (!%p1343_p11)
}
  0x53   :  { %81 = dma.hbm_to_vmem [thread:$0]  %s1552_s7, 4096, %s76_s30, [#allocation9], %s1378_s19, %s1378_s19, %s1379_s20  }
  0x54   :  { %1369 = dma.done.wait [#allocation3], 128  }
  0x55   :  { %1370 = vsyncadd [#allocation3], 4294967168 }
  0x56   :  { %1371 = dma.done.wait [#allocation6], 4608  }
  0x57   :  { %1372 = vsyncadd [#allocation6], 4294962688 }
  0x58   :  { %1373 = dma.done.wait [#allocation9], 8192  }
  0x59   :  { %1374 = vsyncadd [#allocation9], 4294959104  ;;  %v1384_v0 = vmov 0   ;;  %v1081_v1 = vld [vmem:[#allocation5 + $0x4] ss:$8 sps:$4 sm:$0xff]   ;;  %v100_v5 = vld [vmem:[#allocation2] sm:$0xff] }
  0x5a   :  { %174 = vmatprep.mubr.bf16.mxu0 %v1384_v0  ;;  %v1083_v2 = vld [vmem:[#allocation5] ss:$8 sps:$4 sm:$0xff]   ;;  %142 = vmatprep.subr.bf16.mxu0 %v1081_v1  ;;  %v1084_v3 = vld [vmem:[#allocation5 + $0x14] ss:$8 sps:$4 sm:$0xff]   ;;  %v1086_v4 = vld [vmem:[#allocation5 + $0x10] ss:$8 sps:$4 sm:$0xff]   ;;  %v106_v9 = vpack.c.bf16 %v100_v5, %v100_v5 }
  0x5b   :  { %143 = vmatpush1.bf16.msra.mxu0 %v1083_v2  ;;  %v1087_v6 = vld [vmem:[#allocation7 + $0x4] ss:$8 sps:$4 sm:$0xff]   ;;  %v1089_v7 = vld [vmem:[#allocation7] ss:$8 sps:$4 sm:$0xff]   ;;  %v1090_v8 = vld [vmem:[#allocation7 + $0x14] ss:$8 sps:$4 sm:$0xff]  }
  0x5c   :  { %144 = vmatprep.subr.bf16.mxu0 %v1084_v3  ;;  %391 = vmatprep.subr.bf16.mxu1 %v1087_v6  ;;  %v1092_v10 = vld [vmem:[#allocation7 + $0x10] ss:$8 sps:$4 sm:$0xff]   ;;  %vm138_vm0 = vcmask 261120   ;;  %v1093_v11 = vld [vmem:[#allocation7 + $0x24] ss:$8 sps:$4 sm:$0xff]   ;;  %v108_v3 = vlaneseq }
  0x5d   :  { %392 = vmatpush1.bf16.msra.mxu1 %v1089_v7  ;;  %v1095_v12 = vld [vmem:[#allocation7 + $0x20] ss:$8 sps:$4 sm:$0xff]   ;;  %v1096_v13 = vld [vmem:[#allocation7 + $0x34] ss:$8 sps:$4 sm:$0xff]   ;;  %v1098_v14 = vld [vmem:[#allocation7 + $0x30] ss:$8 sps:$4 sm:$0xff]  }
  0x5e   :  { %393 = vmatprep.subr.bf16.mxu1 %v1090_v8  ;;  %v1099_v15 = vld [vmem:[#allocation7 + $0x44] ss:$8 sps:$4 sm:$0xff]   ;;  %v1101_v16 = vld [vmem:[#allocation7 + $0x40] ss:$8 sps:$4 sm:$0xff]   ;;  %v1102_v17 = vld [vmem:[#allocation7 + $0x54] ss:$8 sps:$4 sm:$0xff]  }
  0x5f   :  { %145 = vmatpush1.bf16.msra.mxu0 %v1086_v4  ;;  %v1104_v18 = vld [vmem:[#allocation7 + $0x50] ss:$8 sps:$4 sm:$0xff]   ;;  %v1105_v19 = vld [vmem:[#allocation7 + $0x64] ss:$8 sps:$4 sm:$0xff]   ;;  %v1107_v20 = vld [vmem:[#allocation7 + $0x60] ss:$8 sps:$4 sm:$0xff]  }
  0x60   :  { %v1108_v21 = vld [vmem:[#allocation7 + $0x74] ss:$8 sps:$4 sm:$0xff]   ;;  %v1110_v22 = vld [vmem:[#allocation7 + $0x70] ss:$8 sps:$4 sm:$0xff]   ;;  %v1111_v23 = vld [vmem:[#allocation7 + $0x84] ss:$8 sps:$4 sm:$0xff]  }
  0x61   :  { %394 = vmatpush1.bf16.msra.mxu1 %v1092_v10  ;;  %v1113_v24 = vld [vmem:[#allocation7 + $0x80] ss:$8 sps:$4 sm:$0xff]   ;;  %v1114_v25 = vld [vmem:[#allocation7 + $0x94] ss:$8 sps:$4 sm:$0xff]   ;;  %v1116_v26 = vld [vmem:[#allocation7 + $0x90] ss:$8 sps:$4 sm:$0xff]  }
  0x62   :  { %975 = vmatmul.mubr.msk.bf16.vlgmr.msra.gmra.mrb[0].mxu0 %vm138_vm0, %v106_v9  ;;  %395 = vmatprep.subr.bf16.mxu1 %v1093_v11  ;;  %v1117_v27 = vld [vmem:[#allocation7 + $0xa4] ss:$8 sps:$4 sm:$0xff]   ;;  %v1119_v28 = vld [vmem:[#allocation7 + $0xa0] ss:$8 sps:$4 sm:$0xff]   ;;  %v1120_v29 = vld [vmem:[#allocation7 + $0xb4] ss:$8 sps:$4 sm:$0xff]  }
  0x63   :  { %v1122_v30 = vld [vmem:[#allocation7 + $0xb0] ss:$8 sps:$4 sm:$0xff]   ;;  %v1123_v31 = vld [vmem:[#allocation7 + $0xc4] ss:$8 sps:$4 sm:$0xff]   ;;  %v1125_v32 = vld [vmem:[#allocation7 + $0xc0] ss:$8 sps:$4 sm:$0xff]  }
  0x64   :  { %v1126_v33 = vld [vmem:[#allocation7 + $0xd4] ss:$8 sps:$4 sm:$0xff]   ;;  %v1128_v34 = vld [vmem:[#allocation7 + $0xd0] ss:$8 sps:$4 sm:$0xff]   ;;  %v1129_v35 = vld [vmem:[#allocation7 + $0xe4] ss:$8 sps:$4 sm:$0xff]  }
  0x65   :  { %396 = vmatpush1.bf16.msra.mxu1 %v1095_v12  ;;  %v1131_v36 = vld [vmem:[#allocation7 + $0xe0] ss:$8 sps:$4 sm:$0xff]   ;;  %v1132_v37 = vld [vmem:[#allocation7 + $0xf4] ss:$8 sps:$4 sm:$0xff]   ;;  %v1134_v38 = vld [vmem:[#allocation7 + $0xf0] ss:$8 sps:$4 sm:$0xff]  }
  0x66   :  { %397 = vmatprep.subr.bf16.mxu1 %v1096_v13  ;;  %v1135_v39 = vld [vmem:[#allocation8] ss:$8 sps:$4 sm:$0xff]   ;;  %v1137_v40 = vld [vmem:[#allocation8 + $0x4] ss:$8 sps:$4 sm:$0xff]   ;;  %v1140_v41 = vld [vmem:[#allocation8 + $0x14] ss:$8 sps:$4 sm:$0xff]  }
  0x67   :  { %640 = vmatprep.subr.bf16.mxu0 %v1137_v40  ;;  %v1138_v42 = vld [vmem:[#allocation8 + $0x10] ss:$8 sps:$4 sm:$0xff]   ;;  %v1143_v43 = vld [vmem:[#allocation8 + $0x24] ss:$8 sps:$4 sm:$0xff]   ;;  %v1141_v44 = vld [vmem:[#allocation8 + $0x20] ss:$8 sps:$4 sm:$0xff]  }
  0x68   :  { %641 = vmatpush1.bf16.msra.mxu0 %v1135_v39  ;;  %v1146_v45 = vld [vmem:[#allocation8 + $0x34] ss:$8 sps:$4 sm:$0xff]   ;;  %v1144_v46 = vld [vmem:[#allocation8 + $0x30] ss:$8 sps:$4 sm:$0xff]   ;;  %v1149_v47 = vld [vmem:[#allocation8 + $0x44] ss:$8 sps:$4 sm:$0xff]  }
  0x69   :  { %398 = vmatpush1.bf16.msra.mxu1 %v1098_v14  ;;  %642 = vmatprep.subr.bf16.mxu0 %v1140_v41  ;;  %v1147_v48 = vld [vmem:[#allocation8 + $0x40] ss:$8 sps:$4 sm:$0xff]   ;;  %v1152_v49 = vld [vmem:[#allocation8 + $0x54] ss:$8 sps:$4 sm:$0xff]   ;;  %v1150_v50 = vld [vmem:[#allocation8 + $0x50] ss:$8 sps:$4 sm:$0xff]  }
  0x6a   :  { %399 = vmatprep.subr.bf16.mxu1 %v1099_v15  ;;  %v1155_v51 = vld [vmem:[#allocation8 + $0x64] ss:$8 sps:$4 sm:$0xff]   ;;  %v1153_v52 = vld [vmem:[#allocation8 + $0x60] ss:$8 sps:$4 sm:$0xff]   ;;  %v1158_v53 = vld [vmem:[#allocation8 + $0x74] ss:$8 sps:$4 sm:$0xff]  }
  0x6b   :  { %v1156_v54 = vld [vmem:[#allocation8 + $0x70] ss:$8 sps:$4 sm:$0xff]   ;;  %v1161_v55 = vld [vmem:[#allocation8 + $0x84] ss:$8 sps:$4 sm:$0xff]   ;;  %v1159_v56 = vld [vmem:[#allocation8 + $0x80] ss:$8 sps:$4 sm:$0xff]  }
  0x6c   :  { %643 = vmatpush1.bf16.msra.mxu0 %v1138_v42  ;;  %v1164_v57 = vld [vmem:[#allocation8 + $0x94] ss:$8 sps:$4 sm:$0xff]   ;;  %v1162_v58 = vld [vmem:[#allocation8 + $0x90] ss:$8 sps:$4 sm:$0xff]   ;;  %v1167_v59 = vld [vmem:[#allocation8 + $0xa4] ss:$8 sps:$4 sm:$0xff]  }
  0x6d   :  { %400 = vmatpush1.bf16.msra.mxu1 %v1101_v16  ;;  %644 = vmatprep.subr.bf16.mxu0 %v1143_v43  ;;  %v1165_v60 = vld [vmem:[#allocation8 + $0xa0] ss:$8 sps:$4 sm:$0xff]   ;;  %v1170_v61 = vld [vmem:[#allocation8 + $0xb4] ss:$8 sps:$4 sm:$0xff]   ;;  %v1168_v62 = vld [vmem:[#allocation8 + $0xb0] ss:$8 sps:$4 sm:$0xff]  }
  0x6e   :  { %401 = vmatprep.subr.bf16.mxu1 %v1102_v17  ;;  %v1173_v63 = vld [vmem:[#allocation8 + $0xc4] ss:$8 sps:$4 sm:$0xff]   ;;  %v1171_v0 = vld [vmem:[#allocation8 + $0xc0] ss:$8 sps:$4 sm:$0xff]   ;;  %v1176_v1 = vld [vmem:[#allocation8 + $0xd4] ss:$8 sps:$4 sm:$0xff]  }
  0x6f   :  { %v1174_v2 = vld [vmem:[#allocation8 + $0xd0] ss:$8 sps:$4 sm:$0xff]   ;;  %v109_v4 = vshrl.u32 %v108_v3, 7  ;;  %v1209_v40 = vld [vmem:[#allocation10 + $0x84] ss:$8 sps:$4 sm:$0xff]  }
  0x70   :  { %645 = vmatpush1.bf16.msra.mxu0 %v1141_v44  ;;  %v105_v6 = vld [vmem:[%s1547_s2] sm:$0x3]  ;;  %v1207_v41 = vld [vmem:[#allocation10 + $0x80] ss:$8 sps:$4 sm:$0xff]   ;;  %v1212_v42 = vld [vmem:[#allocation10 + $0x94] ss:$8 sps:$4 sm:$0xff]  }
  0x71   :  { %402 = vmatpush1.bf16.msra.mxu1 %v1104_v18  ;;  %646 = vmatprep.subr.bf16.mxu0 %v1146_v45  ;;  %v1509_v5 = vsub.s32 0, %v109_v4  ;;  %v1514_v7 = vsub.s32 1, %v109_v4  ;;  %v1204_v39 = vld [vmem:[#allocation10 + $0x70] ss:$8 sps:$4 sm:$0xff]   ;;  %v1215_v44 = vld [vmem:[#allocation10 + $0xa4] ss:$8 sps:$4 sm:$0xff]  }
  0x72   :  { %403 = vmatprep.subr.bf16.mxu1 %v1105_v19  ;;  %v1210_v43 = vld [vmem:[#allocation10 + $0x90] ss:$8 sps:$4 sm:$0xff]   ;;  %v1213_v45 = vld [vmem:[#allocation10 + $0xa0] ss:$8 sps:$4 sm:$0xff]   ;;  %v1230_v4 = vld [vmem:[#allocation10 + $0xf4] ss:$8 sps:$4 sm:$0xff]  }
  0x73   :  { %v111_v8 = vrot.slane %v105_v6, %v1509_v5  ;;  %v115_v9 = vrot.slane %v105_v6, %v1514_v7  ;;  %v1228_v6 = vld [vmem:[#allocation10 + $0xf0] ss:$8 sps:$4 sm:$0xff]  }
  0x74   :  { %647 = vmatpush1.bf16.msra.mxu0 %v1144_v46  ;;  %v1218_v46 = vld [vmem:[#allocation10 + $0xb4] ss:$8 sps:$4 sm:$0xff]  }
  0x75   :  { %404 = vmatpush1.bf16.msra.mxu1 %v1107_v20  ;;  %648 = vmatprep.subr.bf16.mxu0 %v1149_v47  ;;  %v1179_v20 = vld [vmem:[#allocation8 + $0xe4] ss:$8 sps:$4 sm:$0xff]   ;;  %v1216_v47 = vld [vmem:[#allocation10 + $0xb0] ss:$8 sps:$4 sm:$0xff]  }
  0x76   :  { %405 = vmatprep.subr.bf16.mxu1 %v1108_v21  ;;  %v1177_v21 = vld [vmem:[#allocation8 + $0xe0] ss:$8 sps:$4 sm:$0xff]  }
  0x78   :  { %649 = vmatpush1.bf16.msra.mxu0 %v1147_v48  ;;  %v1221_v48 = vld [vmem:[#allocation10 + $0xc4] ss:$8 sps:$4 sm:$0xff]  }
  0x79   :  { %406 = vmatpush1.bf16.msra.mxu1 %v1110_v22  ;;  %650 = vmatprep.subr.bf16.mxu0 %v1152_v49  ;;  %v1182_v22 = vld [vmem:[#allocation8 + $0xf4] ss:$8 sps:$4 sm:$0xff]   ;;  %v1219_v49 = vld [vmem:[#allocation10 + $0xc0] ss:$8 sps:$4 sm:$0xff]  }
  0x7a   :  { %407 = vmatprep.subr.bf16.mxu1 %v1111_v23  ;;  %v1180_v23 = vld [vmem:[#allocation8 + $0xf0] ss:$8 sps:$4 sm:$0xff]  }
  0x7c   :  { %651 = vmatpush1.bf16.msra.mxu0 %v1150_v50  ;;  %v1224_v50 = vld [vmem:[#allocation10 + $0xd4] ss:$8 sps:$4 sm:$0xff]  }
  0x7d   :  { %408 = vmatpush1.bf16.msra.mxu1 %v1113_v24  ;;  %652 = vmatprep.subr.bf16.mxu0 %v1155_v51  ;;  %v1183_v24 = vld [vmem:[#allocation10] ss:$8 sps:$4 sm:$0xff]   ;;  %v1222_v51 = vld [vmem:[#allocation10 + $0xd0] ss:$8 sps:$4 sm:$0xff]  }
  0x7e   :  { %409 = vmatprep.subr.bf16.mxu1 %v1114_v25  ;;  %v1185_v25 = vld [vmem:[#allocation10 + $0x4] ss:$8 sps:$4 sm:$0xff]  }
  0x80   :  { %653 = vmatpush1.bf16.msra.mxu0 %v1153_v52  ;;  %v217_v52 = vld [vmem:[%s1549_s4] sm:$0x3] }
  0x81   :  { %410 = vmatpush1.bf16.msra.mxu1 %v1116_v26  ;;  %654 = vmatprep.subr.bf16.mxu0 %v1158_v53  ;;  %v1188_v26 = vld [vmem:[#allocation10 + $0x14] ss:$8 sps:$4 sm:$0xff]   ;;  %v224_v53 = vrot.slane %v217_v52, %v1509_v5 }
  0x82   :  { %411 = vmatprep.subr.bf16.mxu1 %v1117_v27  ;;  %v1186_v27 = vld [vmem:[#allocation10 + $0x10] ss:$8 sps:$4 sm:$0xff]  }
  0x84   :  { %655 = vmatpush1.bf16.msra.mxu0 %v1156_v54  ;;  %v228_v54 = vrot.slane %v217_v52, %v1514_v7 }
  0x85   :  { %412 = vmatpush1.bf16.msra.mxu1 %v1119_v28  ;;  %656 = vmatprep.subr.bf16.mxu0 %v1161_v55  ;;  %v1191_v28 = vld [vmem:[#allocation10 + $0x24] ss:$8 sps:$4 sm:$0xff]  }
  0x86   :  { %413 = vmatprep.subr.bf16.mxu1 %v1120_v29  ;;  %v1189_v29 = vld [vmem:[#allocation10 + $0x20] ss:$8 sps:$4 sm:$0xff]  }
  0x88   :  { %657 = vmatpush1.bf16.msra.mxu0 %v1159_v56 }
  0x89   :  { %414 = vmatpush1.bf16.msra.mxu1 %v1122_v30  ;;  %658 = vmatprep.subr.bf16.mxu0 %v1164_v57  ;;  %v1194_v30 = vld [vmem:[#allocation10 + $0x34] ss:$8 sps:$4 sm:$0xff]  }
  0x8a   :  { %415 = vmatprep.subr.bf16.mxu1 %v1123_v31  ;;  %v1192_v31 = vld [vmem:[#allocation10 + $0x30] ss:$8 sps:$4 sm:$0xff]  }
  0x8c   :  { %659 = vmatpush1.bf16.msra.mxu0 %v1162_v58 }
  0x8d   :  { %416 = vmatpush1.bf16.msra.mxu1 %v1125_v32  ;;  %660 = vmatprep.subr.bf16.mxu0 %v1167_v59  ;;  %v1197_v32 = vld [vmem:[#allocation10 + $0x44] ss:$8 sps:$4 sm:$0xff]  }
  0x8e   :  { %417 = vmatprep.subr.bf16.mxu1 %v1126_v33  ;;  %v1195_v33 = vld [vmem:[#allocation10 + $0x40] ss:$8 sps:$4 sm:$0xff]  }
  0x90   :  { %661 = vmatpush1.bf16.msra.mxu0 %v1165_v60 }
  0x91   :  { %418 = vmatpush1.bf16.msra.mxu1 %v1128_v34  ;;  %662 = vmatprep.subr.bf16.mxu0 %v1170_v61  ;;  %v1200_v34 = vld [vmem:[#allocation10 + $0x54] ss:$8 sps:$4 sm:$0xff]  }
  0x92   :  { %419 = vmatprep.subr.bf16.mxu1 %v1129_v35  ;;  %v1198_v35 = vld [vmem:[#allocation10 + $0x50] ss:$8 sps:$4 sm:$0xff]  }
  0x94   :  { %663 = vmatpush1.bf16.msra.mxu0 %v1168_v62 }
  0x95   :  { %420 = vmatpush1.bf16.msra.mxu1 %v1131_v36  ;;  %664 = vmatprep.subr.bf16.mxu0 %v1173_v63  ;;  %v1203_v36 = vld [vmem:[#allocation10 + $0x64] ss:$8 sps:$4 sm:$0xff]  }
  0x96   :  { %421 = vmatprep.subr.bf16.mxu1 %v1132_v37  ;;  %v1201_v37 = vld [vmem:[#allocation10 + $0x60] ss:$8 sps:$4 sm:$0xff]  }
  0x98   :  { %665 = vmatpush1.bf16.msra.mxu0 %v1171_v0 }
  0x99   :  { %422 = vmatpush1.bf16.msra.mxu1 %v1134_v38  ;;  %666 = vmatprep.subr.bf16.mxu0 %v1176_v1  ;;  %v1206_v38 = vld [vmem:[#allocation10 + $0x74] ss:$8 sps:$4 sm:$0xff]   ;;  %v1227_v1 = vld [vmem:[#allocation10 + $0xe4] ss:$8 sps:$4 sm:$0xff]  }
  0x9a   :  { %889 = vmatprep.subr.bf16.mxu1 %v1185_v25 }
  0x9c   :  { %667 = vmatpush1.bf16.msra.mxu0 %v1174_v2  ;;  %v1225_v2 = vld [vmem:[#allocation10 + $0xe0] ss:$8 sps:$4 sm:$0xff]  }
  0x9d   :  { %668 = vmatprep.subr.bf16.mxu0 %v1179_v20 }
  0xa0   :  { %669 = vmatpush1.bf16.msra.mxu0 %v1177_v21  ;;  %v715_v21 = vld [vmem:[%s1553_s8] sm:$0x3] }
  0xa1   :  { %670 = vmatprep.subr.bf16.mxu0 %v1182_v22  ;;  %v931_v22 = vand.u32 127, %v108_v3 }
  0xa3   :  { %vm933_vm1 = vcmp.lt.s32.totalorder %v931_v22, 16 }
  0xa4   :  { %671 = vmatpush1.bf16.msra.mxu0 %v1180_v23 }
 0x135   :  { %v176_v10 = vpop.f32.mrb[0].mxu0 }
 0x136   :  { %v177_v11 = vadd.f32 %v176_v10, %v111_v8  ;;  %v178_v12 = vpop.f32.mrb[1].mxu0  ;;  %v466_v8 = vld [vmem:[%s1551_s6] sm:$0x3]  ;;  %s1385_s6 = smov [#allocation11]  }
 0x137   :  { %v179_v13 = vadd.f32 %v178_v12, %v115_v9  ;;  %v180_v14 = vpop.f32.mrb[2].mxu0  ;;  %v473_v9 = vrot.slane %v466_v8, %v1509_v5  ;;  %v477_v10 = vrot.slane %v466_v8, %v1514_v7  ;;  %v722_v7 = vrot.slane %v715_v21, %v1509_v5  ;;  %s960_s8 = sshll.u32 %s1385_s6, 4  ;;  %s961_s8 = int_to_ptr.vmem [resolvable:$true] %s960_s8 }
 0x138   :  { %v183_v15 = vmax.f32 %v177_v11, 0.0  ;;  %v181_v16 = vpop.f32.mrb[3].mxu0  ;;  %s1347_s11 = scalar_lea.vmem %s961_s8, 256  ;;  %p1352_p13 = scmp.lt.s32.totalorder %s961_s8, %s961_s8 }
 0x139   :  { %v184_v17 = vmax.f32 %v179_v13, 0.0  ;;  %p1348_p12 = scmp.ne.s32.totalorder %s961_s8, %s1347_s11  ;;  %p1353_p0 = scmp.lt.s32.totalorder %s1347_s11, %s1347_s11 }
 0x13a   :  { %v218_v19 = vpack.c.bf16 %v183_v15, %v183_v15 }
 0x13b   :  { %v219_v18 = vpack.c.bf16 %v184_v17, %v184_v17  ;;  %p1354_p1 = por %p1353_p0, %p1352_p13 }
 0x13d   :  { %423 = vmatprep.mubr.bf16.mxu1 %v219_v18  ;;  %p1355_p2 = pnand %p1354_p1, %p1348_p12 }
 0x13e   :  { %424 = vmatmul.mubr.bf16.vlgmr.msra.gmra.mrb[0].mxu1 %v218_v19 }
 0x13f   :  { %890 = vmatpush1.bf16.msra.mxu1 %v1183_v24 }
 0x140   :  { %891 = vmatprep.subr.bf16.mxu1 %v1188_v26 }
 0x143   :  { %892 = vmatpush1.bf16.msra.mxu1 %v1186_v27 }
 0x144   :  { %893 = vmatprep.subr.bf16.mxu1 %v1191_v28 }
 0x147   :  { %894 = vmatpush1.bf16.msra.mxu1 %v1189_v29 }
 0x148   :  { %895 = vmatprep.subr.bf16.mxu1 %v1194_v30 }
 0x14b   :  { %896 = vmatpush1.bf16.msra.mxu1 %v1192_v31 }
 0x14c   :  { %897 = vmatprep.subr.bf16.mxu1 %v1197_v32 }
 0x14f   :  { %898 = vmatpush1.bf16.msra.mxu1 %v1195_v33 }
 0x150   :  { %899 = vmatprep.subr.bf16.mxu1 %v1200_v34 }
 0x153   :  { %900 = vmatpush1.bf16.msra.mxu1 %v1198_v35 }
 0x154   :  { %901 = vmatprep.subr.bf16.mxu1 %v1203_v36 }
 0x157   :  { %902 = vmatpush1.bf16.msra.mxu1 %v1201_v37 }
 0x158   :  { %903 = vmatprep.subr.bf16.mxu1 %v1206_v38 }
 0x15b   :  { %904 = vmatpush1.bf16.msra.mxu1 %v1204_v39 }
 0x15c   :  { %905 = vmatprep.subr.bf16.mxu1 %v1209_v40 }
 0x15f   :  { %906 = vmatpush1.bf16.msra.mxu1 %v1207_v41 }
 0x160   :  { %907 = vmatprep.subr.bf16.mxu1 %v1212_v42 }
 0x163   :  { %908 = vmatpush1.bf16.msra.mxu1 %v1210_v43 }
 0x164   :  { %909 = vmatprep.subr.bf16.mxu1 %v1215_v44 }
 0x167   :  { %910 = vmatpush1.bf16.msra.mxu1 %v1213_v45 }
 0x168   :  { %911 = vmatprep.subr.bf16.mxu1 %v1218_v46 }
 0x16b   :  { %912 = vmatpush1.bf16.msra.mxu1 %v1216_v47 }
 0x16c   :  { %913 = vmatprep.subr.bf16.mxu1 %v1221_v48 }
 0x16f   :  { %914 = vmatpush1.bf16.msra.mxu1 %v1219_v49 }
 0x170   :  { %915 = vmatprep.subr.bf16.mxu1 %v1224_v50 }
 0x173   :  { %916 = vmatpush1.bf16.msra.mxu1 %v1222_v51 }
 0x174   :  { %917 = vmatprep.subr.bf16.mxu1 %v1227_v1 }
 0x177   :  { %918 = vmatpush1.bf16.msra.mxu1 %v1225_v2 }
 0x178   :  { %919 = vmatprep.subr.bf16.mxu1 %v1230_v4 }
 0x17b   :  { %920 = vmatpush1.bf16.msra.mxu1 %v1228_v6 }
 0x211   :  { %v425_v55 = vpop.f32.mrb[0].mxu1 }
 0x212   :  { %v426_v56 = vadd.f32 %v425_v55, %v224_v53  ;;  %v427_v57 = vpop.f32.mrb[1].mxu1 }
 0x213   :  { %v428_v58 = vadd.f32 %v427_v57, %v228_v54  ;;  %v429_v59 = vpop.f32.mrb[2].mxu1 }
 0x214   :  { %v432_v60 = vmax.f32 %v426_v56, 0.0  ;;  %v430_v61 = vpop.f32.mrb[3].mxu1 }
 0x215   :  { %v433_v62 = vmax.f32 %v428_v58, 0.0 }
 0x216   :  { %v467_v0 = vpack.c.bf16 %v432_v60, %v432_v60 }
 0x217   :  { %v468_v63 = vpack.c.bf16 %v433_v62, %v433_v62 }
 0x219   :  { %672 = vmatprep.mubr.bf16.mxu0 %v468_v63 }
 0x21a   :  { %673 = vmatmul.mubr.bf16.vlgmr.msra.gmra.mrb[4].mxu0 %v467_v0 }
 0x2ed   :  { %v674_v11 = vpop.f32.mrb[4].mxu0 }
 0x2ee   :  { %v675_v12 = vadd.f32 %v674_v11, %v473_v9  ;;  %v676_v13 = vpop.f32.mrb[5].mxu0 }
 0x2ef   :  { %v677_v14 = vadd.f32 %v676_v13, %v477_v10  ;;  %v678_v15 = vpop.f32.mrb[6].mxu0 }
 0x2f0   :  { %v681_v16 = vmax.f32 %v675_v12, 0.0  ;;  %v679_v17 = vpop.f32.mrb[7].mxu0 }
 0x2f1   :  { %v682_v18 = vmax.f32 %v677_v14, 0.0 }
 0x2f2   :  { %v716_v20 = vpack.c.bf16 %v681_v16, %v681_v16 }
 0x2f3   :  { %v717_v19 = vpack.c.bf16 %v682_v18, %v682_v18 }
 0x2f5   :  { %921 = vmatprep.mubr.bf16.mxu1 %v717_v19 }
 0x2f6   :  { %922 = vmatmul.mubr.bf16.vlgmr.msra.gmra.mrb[4].mxu1 %v716_v20 }
 0x3c9   :  { %v923_v23 = vpop.f32.mrb[4].mxu1 }
 0x3ca   :  { %v924_v24 = vadd.f32 %v923_v23, %v722_v7  ;;  %v925_v25 = vpop.f32.mrb[5].mxu1 }
 0x3cb   :  { %v927_v26 = vpop.f32.mrb[6].mxu1 }
 0x3cc   :  { %v928_v27 = vpop.f32.mrb[7].mxu1  ;;  %v935_v28 = vsel %vm933_vm1, %v924_v24, -1e+30 }
 0x3cd   :  { %v937_v29 = vmax.f32 %v935_v28, -1e+30 }
 0x3cf   :  { %938 = vmax.xlane.f32.xlu0 %v937_v29 }
 0x45c   :  { %v939_v30 = vpop.xlane.xlu0 %938 }
 0x45d   :  { %v940_v31 = vsub.f32 %v935_v28, %v939_v30  ;;  %v941_v32 = vsub.f32 -1e+30, %v939_v30 }
 0x45f   :  { %v942_v33 = vmul.f32 1.442695, %v940_v31  ;;  %v944_v34 = vmul.f32 1.442695, %v941_v32 }
 0x461   :  { %1231 = vpow2.f32 %v942_v33 }
 0x462   :  { %1233 = vpow2.f32 %v944_v34 }
 0x46b   :  { %v1232_v35 = vpop.eup %1231 }
 0x46c   :  { %v1234_v3 = vpop.eup %1233 }
 0x46d   :  { %v946_v36 = vadd.f32 %v1234_v3, %v1232_v35 }
 0x46f   :  { %947 = vadd.xlane.f32.xlu0 %v946_v36 }
 0x4fc   :  { %v948_v5 = vpop.xlane.xlu0 %947 }
 0x4fd   :  { %1235 = vrcp.f32 %v948_v5 }
 0x507   :  { %v1236_v37 = vpop.eup %1235 }
 0x508   :  { %v950_v38 = vmul.f32 %v1236_v37, %v1232_v35  ;;  %v951_v39 = vmul.f32 %v1236_v37, %v1234_v3 }
 0x50a   :  { %952 = vst [vmem:[#allocation11] sm:$0xff] %v950_v38  ;;  %953 = vst [vmem:[#allocation11 + $0x8] sm:$0xff] %v951_v39 }
 0x50b   :  { %1358 = shalt.err (!%p1355_p2)
}
 0x50c   :  { %s1359_s1 = scalar_lea.hbm %s1554_s9, 256 }
 0x50d   :  { %p1360_p3 = scmp.ne.s32.totalorder %s1554_s9, %s1359_s1  ;;  %p1363_p4 = scmp.lt.u32.totalorder %s1359_s1, %s1554_s9 }
 0x50f   :  { %p1365_p5 = pnand %p1363_p4, %p1360_p3 }
 0x511   :  { %1368 = shalt.err (!%p1365_p5)
}
 0x512   :  { %963 = dma.vmem_to_hbm [thread:$0]  %s961_s8, 256, %s1554_s9, [#allocation4]  }
 0x513   :  { %1375 = dma.done.wait [#allocation4], 256  }
 0x514   :  { %1376 = vsyncadd [#allocation4], 4294967040 }
 0x515   :  { %967 = vsyncpa [#allocation3], 1 }
 0x516   :  { %968 = vsyncpa [#allocation6], 1 }
 0x517   :  { %969 = vsyncpa [#allocation9], 1 }
 0x518   :  { %970 = vsyncpa [#allocation4], 1 }

</bundles_post_ra>
